<compile_context>
chip_gen: v7x
topology: tpu7x:2x2x1
jax: 0.10.0
libtpu: 0.0.40
codegen_flags: <defaults>
</compile_context>

<pallas_src>
import math

import jax
import jax.numpy as jnp
from jax.experimental import pallas as pl
from jax.experimental.pallas import tpu as pltpu


def _silu(v):
    # sigmoid via approx reciprocal -> EUP slot, essentially free next to MXU.
    sig = pl.reciprocal(1.0 + jnp.exp(-v), approx=True)
    return v * sig


def film_point_mlp_kernel(
    # activations (batch tile)
    x_ref, td_ref, tdm_ref,
    # packed K=1 embedding first layers (VPU broadcast-FMA path)
    w1p_ref, b1p_ref,
    # fused (emb-second-layer ∘ all-six-FiLM-projections) matmul: (Cp, 6H)
    wcond_ref, bcond_ref,
    # trunk
    wfc1_ref, bfc1_ref,
    wfc2_ref, bfc2_ref,
    wfc3_ref, bfc3_ref,
    # output head (lane-padded to 128)
    wout_ref, bout_ref,
    # output
    o_ref,
):
    f32 = jnp.float32
    bf16 = jnp.bfloat16
    H = wfc2_ref.shape[0]        # hidden_dim
    P = x_ref.shape[1]           # point_dim

    # ---- conditioning path (independent of the trunk) ----
    # first embedding layers: Linear(1, T) / Linear(1, D) == broadcast FMA (VPU)
    td = td_ref[...]                                                  # (TB, 1)
    tdm = tdm_ref[...]                                                # (TB, 1)
    h1 = td * w1p_ref[0:1, :] + tdm * w1p_ref[1:2, :] + b1p_ref[...]  # (TB, Cp)
    h1 = _silu(h1)
    # one lane-dense matmul produces all six FiLM gamma/beta vectors at once
    # (the embedding second layers are composed into wcond offline).
    gb = jnp.dot(h1.astype(bf16), wcond_ref[...],
                 preferred_element_type=f32) + bcond_ref[...]         # (TB, 6H)

    def film(h, layer):
        # gamma columns already include the FiLM "+1" (folded into bcond).
        g = gb[:, (2 * layer) * H:(2 * layer + 1) * H]
        b = gb[:, (2 * layer + 1) * H:(2 * layer + 2) * H]
        return h * g + b

    # ---- trunk ----
    x = x_ref[...]
    if P <= 8:
        # fc1 with tiny K: broadcast FMAs on the VPU, off the MXU critical path
        h = bfc1_ref[...] + x[:, 0:1] * wfc1_ref[0:1, :]
        for k in range(1, P):
            h = h + x[:, k:k + 1] * wfc1_ref[k:k + 1, :]
    else:
        h = jnp.dot(x.astype(bf16), wfc1_ref[...].astype(bf16),
                    preferred_element_type=f32) + bfc1_ref[...]
    h = _silu(film(h, 0))

    h = jnp.dot(h.astype(bf16), wfc2_ref[...],
                preferred_element_type=f32) + bfc2_ref[...]
    h = _silu(film(h, 1))

    h = jnp.dot(h.astype(bf16), wfc3_ref[...],
                preferred_element_type=f32) + bfc3_ref[...]
    h = _silu(film(h, 2))

    # lane-dense (N padded to 128) output store
    o_ref[...] = jnp.dot(h.astype(bf16), wout_ref[...],
                         preferred_element_type=f32) + bout_ref[...]


def film_point_mlp(x, t_diffusion, t_domain, kernel_params, *, block_b=256):
    """x: (B, P), t_diffusion/t_domain: (B,). Returns (B, P) float32."""
    B, P = x.shape
    (w1p, b1p, wcond, bcond,
     wfc1, bfc1, wfc2, bfc2, wfc3, bfc3, woutp, boutp) = kernel_params
    out_pad = woutp.shape[1]
    H = wfc2.shape[0]
    Cp = wcond.shape[0]
    six_h = wcond.shape[1]

    # batch tiling (sublane-aligned; modest tiles keep v7x's 64 MiB VMEM happy)
    tb = min(block_b, max(B, 8))
    tb = ((tb + 7) // 8) * 8
    nb = (B + tb - 1) // tb
    Bp = nb * tb

    x32 = x.astype(jnp.float32)
    td = t_diffusion.reshape(B, 1).astype(jnp.float32)
    tdm = t_domain.reshape(B, 1).astype(jnp.float32)
    if Bp != B:
        pad = ((0, Bp - B), (0, 0))
        x32 = jnp.pad(x32, pad)
        td = jnp.pad(td, pad)
        tdm = jnp.pad(tdm, pad)

    weights = [w1p, b1p, wcond, bcond,
               wfc1, bfc1, wfc2, bfc2, wfc3, bfc3, woutp, boutp]

    def act_spec(last):
        return pl.BlockSpec((tb, last), lambda i: (i, 0))

    w_specs = [pl.BlockSpec(w.shape, lambda i: (0, 0)) for w in weights]

    flops = 2 * Bp * (Cp * six_h + P * H + 2 * H * H + H * out_pad)
    transcendentals = Bp * (Cp + 3 * H)
    bytes_accessed = int(
        Bp * (P + 2 + out_pad) * 4
        + sum(int(w.size) * int(w.dtype.itemsize) for w in weights))

    out = pl.pallas_call(
        film_point_mlp_kernel,
        out_shape=jax.ShapeDtypeStruct((Bp, out_pad), jnp.float32),
        grid=(nb,),
        in_specs=[act_spec(P), act_spec(1), act_spec(1)] + w_specs,
        out_specs=pl.BlockSpec((tb, out_pad), lambda i: (i, 0)),
        compiler_params=pltpu.CompilerParams(
            dimension_semantics=("parallel",),
            vmem_limit_bytes=32 * 1024 * 1024),
        cost_estimate=pl.CostEstimate(
            flops=int(flops),
            transcendentals=int(transcendentals),
            bytes_accessed=bytes_accessed),
    )(x32, td, tdm, *weights)

    return out[:B, :P]


# -------------------- deterministic parameter construction --------------------

def _linear(key, fan_in, fan_out):
    """PyTorch-style nn.Linear init, stored as (in, out) weight + (1, out) bias."""
    k1, k2 = jax.random.split(key)
    bound = 1.0 / math.sqrt(fan_in)
    w = jax.random.uniform(k1, (fan_in, fan_out), jnp.float32, -bound, bound)
    b = jax.random.uniform(k2, (1, fan_out), jnp.float32, -bound, bound)
    return w, b


def make_params(key, point_dim, t_dim, d_dim, hidden):
    cond_dim = t_dim + d_dim
    keys = jax.random.split(key, 14)
    p = {}
    p["wt1"], p["bt1"] = _linear(keys[0], 1, t_dim)
    p["wt2"], p["bt2"] = _linear(keys[1], t_dim, t_dim)
    p["wd1"], p["bd1"] = _linear(keys[2], 1, d_dim)
    p["wd2"], p["bd2"] = _linear(keys[3], d_dim, d_dim)
    p["wfc1"], p["bfc1"] = _linear(keys[4], point_dim, hidden)
    p["wfc2"], p["bfc2"] = _linear(keys[5], hidden, hidden)
    p["wfc3"], p["bfc3"] = _linear(keys[6], hidden, hidden)
    p["wout"], p["bout"] = _linear(keys[7], hidden, point_dim)
    p["wg1"], p["bg1"] = _linear(keys[8], cond_dim, hidden)
    p["wb1"], p["bb1"] = _linear(keys[9], cond_dim, hidden)
    p["wg2"], p["bg2"] = _linear(keys[10], cond_dim, hidden)
    p["wb2"], p["bb2"] = _linear(keys[11], cond_dim, hidden)
    p["wg3"], p["bg3"] = _linear(keys[12], cond_dim, hidden)
    p["wb3"], p["bb3"] = _linear(keys[13], cond_dim, hidden)
    return p


def pack_kernel_params(p, point_dim, t_dim, d_dim, hidden):
    """Pack / fuse / pad / cast module-style params into the kernel layout."""
    bf16 = jnp.bfloat16
    T, D, H = t_dim, d_dim, hidden
    C = T + D
    Cp = max(128, ((C + 127) // 128) * 128)        # lane-dense cond width

    # first embedding layers (K=1) packed: row 0 = time weights, row 1 = domain,
    # lane-padded to Cp with zeros (padded h1 columns are silu(0) == 0).
    w1p = jnp.zeros((2, Cp), jnp.float32)
    w1p = w1p.at[0, :T].set(p["wt1"][0]).at[1, T:C].set(p["wd1"][0])
    b1p = jnp.zeros((1, Cp), jnp.float32)
    b1p = b1p.at[0, :T].set(p["bt1"][0]).at[0, T:C].set(p["bd1"][0])

    # block-diagonal second embedding layer, rows padded to Cp
    w2p = jnp.zeros((Cp, C), jnp.float32)
    w2p = w2p.at[:T, :T].set(p["wt2"]).at[T:C, T:].set(p["wd2"])
    b2p = jnp.concatenate([p["bt2"], p["bd2"]], axis=1)                 # (1, C)

    # all six FiLM projections packed along N: [g1|b1|g2|b2|g3|b3]
    wfilm = jnp.concatenate(
        [p["wg1"], p["wb1"], p["wg2"], p["wb2"], p["wg3"], p["wb3"]], axis=1)
    bfilm = jnp.concatenate(
        [p["bg1"], p["bb1"], p["bg2"], p["bb2"], p["bg3"], p["bb3"]], axis=1)

    # compose (linear ∘ linear): fold the embedding second layer into the FiLM
    # projections so the cond path needs only ONE in-kernel matmul.
    wcond = w2p @ wfilm                                                 # (Cp, 6H)
    bcond = b2p @ wfilm + bfilm                                         # (1, 6H)
    # fold the FiLM "1 + gamma" into the gamma bias columns.
    film_one = jnp.zeros((1, 6 * H), jnp.float32)
    for layer in range(3):
        film_one = film_one.at[0, 2 * layer * H:(2 * layer + 1) * H].set(1.0)
    bcond = bcond + film_one

    # lane-dense output head: pad N up to a multiple of 128 (>= 128)
    out_pad = max(128, ((point_dim + 127) // 128) * 128)
    woutp = jnp.pad(p["wout"], ((0, 0), (0, out_pad - point_dim)))
    boutp = jnp.pad(p["bout"], ((0, 0), (0, out_pad - point_dim)))

    # bf16 for MXU operands (f32 accumulation in-kernel); biases / VPU-side f32
    return (w1p, b1p, wcond.astype(bf16), bcond,
            p["wfc1"], p["bfc1"],
            p["wfc2"].astype(bf16), p["bfc2"],
            p["wfc3"].astype(bf16), p["bfc3"],
            woutp.astype(bf16), boutp)


# -------------------- pure-JAX reference for verification --------------------

def reference_forward(x, t_diffusion, t_domain, p):
    silu = jax.nn.silu
    td = t_diffusion[:, None]
    tdm = t_domain[:, None]
    t_emb = silu(td @ p["wt1"] + p["bt1"]) @ p["wt2"] + p["bt2"]
    d_emb = silu(tdm @ p["wd1"] + p["bd1"]) @ p["wd2"] + p["bd2"]
    cond = jnp.concatenate([t_emb, d_emb], axis=-1)

    def film(h, wg, bg, wb, bb):
        return h * (1.0 + cond @ wg + bg) + (cond @ wb + bb)

    h = x @ p["wfc1"] + p["bfc1"]
    h = silu(film(h, p["wg1"], p["bg1"], p["wb1"], p["bb1"]))
    h = h @ p["wfc2"] + p["bfc2"]
    h = silu(film(h, p["wg2"], p["bg2"], p["wb2"], p["bb2"]))
    h = h @ p["wfc3"] + p["bfc3"]
    h = silu(film(h, p["wg3"], p["bg3"], p["wb3"], p["bb3"]))
    return h @ p["wout"] + p["bout"]


if __name__ == "__main__":
    B = 256          # batch (two grid tiles of 128 -> exercises pipelining)
    POINT_DIM = 2    # 2-D points
    T_DIM = 64       # diffusion_time_embed_dim
    D_DIM = 32       # domain_embed_dim
    HIDDEN = 128     # hidden_dim

    key = jax.random.PRNGKey(0)
    kx, kt, kd, kp = jax.random.split(key, 4)

    x = jax.random.normal(kx, (B, POINT_DIM), jnp.float32)
    t_diffusion = jax.random.uniform(kt, (B,), jnp.float32)
    t_domain = jax.random.uniform(kd, (B,), jnp.float32)

    params = make_params(kp, POINT_DIM, T_DIM, D_DIM, HIDDEN)
    kparams = pack_kernel_params(params, POINT_DIM, T_DIM, D_DIM, HIDDEN)

    out = film_point_mlp(x, t_diffusion, t_domain, kparams, block_b=128)
    out = jax.block_until_ready(out)

    ref = reference_forward(x, t_diffusion, t_domain, params)
    assert out.shape == (B, POINT_DIM), out.shape
    # bf16 MXU inputs (f32 accumulation) vs f32 reference: slightly looser tol.
    err = jnp.max(jnp.abs(out - ref))
    assert jnp.allclose(out, ref, rtol=2e-2, atol=2e-2), f"max abs err {err}"

    print("KERNEL_OK")
</pallas_src>

<mosaic_0001>
module attributes {stable_mosaic.version = 11 : i64} {
  func.func @film_point_mlp_kernel(%arg0: i32, %arg1: memref<128x2xf32, #tpu.memory_space<vmem>>, %arg2: memref<128x1xf32, #tpu.memory_space<vmem>>, %arg3: memref<128x1xf32, #tpu.memory_space<vmem>>, %arg4: memref<2x128xf32, #tpu.memory_space<vmem>>, %arg5: memref<1x128xf32, #tpu.memory_space<vmem>>, %arg6: memref<128x768xbf16, #tpu.memory_space<vmem>>, %arg7: memref<1x768xf32, #tpu.memory_space<vmem>>, %arg8: memref<2x128xf32, #tpu.memory_space<vmem>>, %arg9: memref<1x128xf32, #tpu.memory_space<vmem>>, %arg10: memref<128x128xbf16, #tpu.memory_space<vmem>>, %arg11: memref<1x128xf32, #tpu.memory_space<vmem>>, %arg12: memref<128x128xbf16, #tpu.memory_space<vmem>>, %arg13: memref<1x128xf32, #tpu.memory_space<vmem>>, %arg14: memref<128x128xbf16, #tpu.memory_space<vmem>>, %arg15: memref<1x128xf32, #tpu.memory_space<vmem>>, %arg16: memref<128x128xf32, #tpu.memory_space<vmem>>) attributes {dimension_semantics = [#tpu.dimension_semantics<parallel>], iteration_bounds = array<i64: 2>, scalar_prefetch = 0 : i64, scratch_operands = 0 : i64, tpu.core_type = #tpu.core_type<tc>, window_params = [{transform_indices = @transform_0, window_bounds = array<i64: 128, 2>}, {transform_indices = @transform_1, window_bounds = array<i64: 128, 1>}, {transform_indices = @transform_2, window_bounds = array<i64: 128, 1>}, {pipeline_mode = #tpu.pipeline_mode<synchronous>, transform_indices = @transform_3, window_bounds = array<i64: 2, 128>}, {pipeline_mode = #tpu.pipeline_mode<synchronous>, transform_indices = @transform_4, window_bounds = array<i64: 1, 128>}, {pipeline_mode = #tpu.pipeline_mode<synchronous>, transform_indices = @transform_5, window_bounds = array<i64: 128, 768>}, {pipeline_mode = #tpu.pipeline_mode<synchronous>, transform_indices = @transform_6, window_bounds = array<i64: 1, 768>}, {pipeline_mode = #tpu.pipeline_mode<synchronous>, transform_indices = @transform_7, window_bounds = array<i64: 2, 128>}, {pipeline_mode = #tpu.pipeline_mode<synchronous>, transform_indices = @transform_8, window_bounds = array<i64: 1, 128>}, {pipeline_mode = #tpu.pipeline_mode<synchronous>, transform_indices = @transform_9, window_bounds = array<i64: 128, 128>}, {pipeline_mode = #tpu.pipeline_mode<synchronous>, transform_indices = @transform_10, window_bounds = array<i64: 1, 128>}, {pipeline_mode = #tpu.pipeline_mode<synchronous>, transform_indices = @transform_11, window_bounds = array<i64: 128, 128>}, {pipeline_mode = #tpu.pipeline_mode<synchronous>, transform_indices = @transform_12, window_bounds = array<i64: 1, 128>}, {pipeline_mode = #tpu.pipeline_mode<synchronous>, transform_indices = @transform_13, window_bounds = array<i64: 128, 128>}, {pipeline_mode = #tpu.pipeline_mode<synchronous>, transform_indices = @transform_14, window_bounds = array<i64: 1, 128>}, {transform_indices = @transform_15, window_bounds = array<i64: 128, 128>}]} {
    %c0 = arith.constant 0 : index
    %c0_0 = arith.constant 0 : index
    %0 = vector.load %arg2[%c0, %c0_0] : memref<128x1xf32, #tpu.memory_space<vmem>>, vector<128x1xf32>
    %c0_1 = arith.constant 0 : index
    %c0_2 = arith.constant 0 : index
    %1 = vector.load %arg3[%c0_1, %c0_2] : memref<128x1xf32, #tpu.memory_space<vmem>>, vector<128x1xf32>
    %c0_3 = arith.constant 0 : index
    %c0_4 = arith.constant 0 : index
    %2 = vector.load %arg4[%c0_3, %c0_4] : memref<2x128xf32, #tpu.memory_space<vmem>>, vector<1x128xf32>
    %3 = vector.broadcast %0 : vector<128x1xf32> to vector<128x128xf32>
    %4 = vector.broadcast %2 : vector<1x128xf32> to vector<128x128xf32>
    %5 = arith.mulf %3, %4 : vector<128x128xf32>
    %c1 = arith.constant 1 : index
    %c0_5 = arith.constant 0 : index
    %6 = vector.load %arg4[%c1, %c0_5] : memref<2x128xf32, #tpu.memory_space<vmem>>, vector<1x128xf32>
    %7 = vector.broadcast %1 : vector<128x1xf32> to vector<128x128xf32>
    %8 = vector.broadcast %6 : vector<1x128xf32> to vector<128x128xf32>
    %9 = arith.mulf %7, %8 : vector<128x128xf32>
    %10 = arith.addf %5, %9 : vector<128x128xf32>
    %c0_6 = arith.constant 0 : index
    %c0_7 = arith.constant 0 : index
    %11 = vector.load %arg5[%c0_6, %c0_7] : memref<1x128xf32, #tpu.memory_space<vmem>>, vector<1x128xf32>
    %12 = vector.broadcast %11 : vector<1x128xf32> to vector<128x128xf32>
    %13 = arith.addf %10, %12 : vector<128x128xf32>
    %cst = arith.constant 0.000000e+00 : f32
    %14 = vector.broadcast %cst : f32 to vector<128x128xf32>
    %15 = arith.subf %14, %13 : vector<128x128xf32>
    %16 = math.exp %15 : vector<128x128xf32>
    %cst_8 = arith.constant 1.000000e+00 : f32
    %17 = vector.broadcast %cst_8 : f32 to vector<128x128xf32>
    %18 = arith.addf %17, %16 : vector<128x128xf32>
    %19 = tpu.reciprocal %18 {approx = true} : vector<128x128xf32> -> vector<128x128xf32>
    %20 = arith.mulf %13, %19 : vector<128x128xf32>
    %21 = arith.truncf %20 : vector<128x128xf32> to vector<128x128xbf16>
    %c0_9 = arith.constant 0 : index
    %c0_10 = arith.constant 0 : index
    %22 = vector.load %arg6[%c0_9, %c0_10] : memref<128x768xbf16, #tpu.memory_space<vmem>>, vector<128x768xbf16>
    %cst_11 = arith.constant dense<0.000000e+00> : vector<128x768xf32>
    %23 = tpu.matmul %21, %22, %cst_11 {dimension_numbers = #tpu.dot_dimension_numbers<[1], [0], [0], [1], [0, 0, 1, 1], [], []>} : vector<128x128xbf16>, vector<128x768xbf16>, vector<128x768xf32> -> vector<128x768xf32>
    %c0_12 = arith.constant 0 : index
    %c0_13 = arith.constant 0 : index
    %24 = vector.load %arg7[%c0_12, %c0_13] : memref<1x768xf32, #tpu.memory_space<vmem>>, vector<1x768xf32>
    %25 = vector.broadcast %24 : vector<1x768xf32> to vector<128x768xf32>
    %26 = arith.addf %23, %25 : vector<128x768xf32>
    %c0_14 = arith.constant 0 : index
    %c0_15 = arith.constant 0 : index
    %27 = vector.load %arg1[%c0_14, %c0_15] : memref<128x2xf32, #tpu.memory_space<vmem>>, vector<128x2xf32>
    %c0_16 = arith.constant 0 : index
    %c0_17 = arith.constant 0 : index
    %28 = vector.load %arg9[%c0_16, %c0_17] : memref<1x128xf32, #tpu.memory_space<vmem>>, vector<1x128xf32>
    %29 = vector.extract_strided_slice %27 {offsets = [0, 0], sizes = [128, 1], strides = [1, 1]} : vector<128x2xf32> to vector<128x1xf32>
    %c0_18 = arith.constant 0 : index
    %c0_19 = arith.constant 0 : index
    %30 = vector.load %arg8[%c0_18, %c0_19] : memref<2x128xf32, #tpu.memory_space<vmem>>, vector<1x128xf32>
    %31 = vector.broadcast %29 : vector<128x1xf32> to vector<128x128xf32>
    %32 = vector.broadcast %30 : vector<1x128xf32> to vector<128x128xf32>
    %33 = arith.mulf %31, %32 : vector<128x128xf32>
    %34 = vector.broadcast %28 : vector<1x128xf32> to vector<128x128xf32>
    %35 = arith.addf %34, %33 : vector<128x128xf32>
    %36 = vector.extract_strided_slice %27 {offsets = [0, 1], sizes = [128, 1], strides = [1, 1]} : vector<128x2xf32> to vector<128x1xf32>
    %c1_20 = arith.constant 1 : index
    %c0_21 = arith.constant 0 : index
    %37 = vector.load %arg8[%c1_20, %c0_21] : memref<2x128xf32, #tpu.memory_space<vmem>>, vector<1x128xf32>
    %38 = vector.broadcast %36 : vector<128x1xf32> to vector<128x128xf32>
    %39 = vector.broadcast %37 : vector<1x128xf32> to vector<128x128xf32>
    %40 = arith.mulf %38, %39 : vector<128x128xf32>
    %41 = arith.addf %35, %40 : vector<128x128xf32>
    %42 = vector.extract_strided_slice %26 {offsets = [0, 0], sizes = [128, 128], strides = [1, 1]} : vector<128x768xf32> to vector<128x128xf32>
    %43 = vector.extract_strided_slice %26 {offsets = [0, 128], sizes = [128, 128], strides = [1, 1]} : vector<128x768xf32> to vector<128x128xf32>
    %44 = arith.mulf %41, %42 : vector<128x128xf32>
    %45 = arith.addf %44, %43 : vector<128x128xf32>
    %cst_22 = arith.constant 0.000000e+00 : f32
    %46 = vector.broadcast %cst_22 : f32 to vector<128x128xf32>
    %47 = arith.subf %46, %45 : vector<128x128xf32>
    %48 = math.exp %47 : vector<128x128xf32>
    %cst_23 = arith.constant 1.000000e+00 : f32
    %49 = vector.broadcast %cst_23 : f32 to vector<128x128xf32>
    %50 = arith.addf %49, %48 : vector<128x128xf32>
    %51 = tpu.reciprocal %50 {approx = true} : vector<128x128xf32> -> vector<128x128xf32>
    %52 = arith.mulf %45, %51 : vector<128x128xf32>
    %53 = arith.truncf %52 : vector<128x128xf32> to vector<128x128xbf16>
    %c0_24 = arith.constant 0 : index
    %c0_25 = arith.constant 0 : index
    %54 = vector.load %arg10[%c0_24, %c0_25] : memref<128x128xbf16, #tpu.memory_space<vmem>>, vector<128x128xbf16>
    %cst_26 = arith.constant dense<0.000000e+00> : vector<128x128xf32>
    %55 = tpu.matmul %53, %54, %cst_26 {dimension_numbers = #tpu.dot_dimension_numbers<[1], [0], [0], [1], [0, 0, 1, 1], [], []>} : vector<128x128xbf16>, vector<128x128xbf16>, vector<128x128xf32> -> vector<128x128xf32>
    %c0_27 = arith.constant 0 : index
    %c0_28 = arith.constant 0 : index
    %56 = vector.load %arg11[%c0_27, %c0_28] : memref<1x128xf32, #tpu.memory_space<vmem>>, vector<1x128xf32>
    %57 = vector.broadcast %56 : vector<1x128xf32> to vector<128x128xf32>
    %58 = arith.addf %55, %57 : vector<128x128xf32>
    %59 = vector.extract_strided_slice %26 {offsets = [0, 256], sizes = [128, 128], strides = [1, 1]} : vector<128x768xf32> to vector<128x128xf32>
    %60 = vector.extract_strided_slice %26 {offsets = [0, 384], sizes = [128, 128], strides = [1, 1]} : vector<128x768xf32> to vector<128x128xf32>
    %61 = arith.mulf %58, %59 : vector<128x128xf32>
    %62 = arith.addf %61, %60 : vector<128x128xf32>
    %cst_29 = arith.constant 0.000000e+00 : f32
    %63 = vector.broadcast %cst_29 : f32 to vector<128x128xf32>
    %64 = arith.subf %63, %62 : vector<128x128xf32>
    %65 = math.exp %64 : vector<128x128xf32>
    %cst_30 = arith.constant 1.000000e+00 : f32
    %66 = vector.broadcast %cst_30 : f32 to vector<128x128xf32>
    %67 = arith.addf %66, %65 : vector<128x128xf32>
    %68 = tpu.reciprocal %67 {approx = true} : vector<128x128xf32> -> vector<128x128xf32>
    %69 = arith.mulf %62, %68 : vector<128x128xf32>
    %70 = arith.truncf %69 : vector<128x128xf32> to vector<128x128xbf16>
    %c0_31 = arith.constant 0 : index
    %c0_32 = arith.constant 0 : index
    %71 = vector.load %arg12[%c0_31, %c0_32] : memref<128x128xbf16, #tpu.memory_space<vmem>>, vector<128x128xbf16>
    %cst_33 = arith.constant dense<0.000000e+00> : vector<128x128xf32>
    %72 = tpu.matmul %70, %71, %cst_33 {dimension_numbers = #tpu.dot_dimension_numbers<[1], [0], [0], [1], [0, 0, 1, 1], [], []>} : vector<128x128xbf16>, vector<128x128xbf16>, vector<128x128xf32> -> vector<128x128xf32>
    %c0_34 = arith.constant 0 : index
    %c0_35 = arith.constant 0 : index
    %73 = vector.load %arg13[%c0_34, %c0_35] : memref<1x128xf32, #tpu.memory_space<vmem>>, vector<1x128xf32>
    %74 = vector.broadcast %73 : vector<1x128xf32> to vector<128x128xf32>
    %75 = arith.addf %72, %74 : vector<128x128xf32>
    %76 = vector.extract_strided_slice %26 {offsets = [0, 512], sizes = [128, 128], strides = [1, 1]} : vector<128x768xf32> to vector<128x128xf32>
    %77 = vector.extract_strided_slice %26 {offsets = [0, 640], sizes = [128, 128], strides = [1, 1]} : vector<128x768xf32> to vector<128x128xf32>
    %78 = arith.mulf %75, %76 : vector<128x128xf32>
    %79 = arith.addf %78, %77 : vector<128x128xf32>
    %cst_36 = arith.constant 0.000000e+00 : f32
    %80 = vector.broadcast %cst_36 : f32 to vector<128x128xf32>
    %81 = arith.subf %80, %79 : vector<128x128xf32>
    %82 = math.exp %81 : vector<128x128xf32>
    %cst_37 = arith.constant 1.000000e+00 : f32
    %83 = vector.broadcast %cst_37 : f32 to vector<128x128xf32>
    %84 = arith.addf %83, %82 : vector<128x128xf32>
    %85 = tpu.reciprocal %84 {approx = true} : vector<128x128xf32> -> vector<128x128xf32>
    %86 = arith.mulf %79, %85 : vector<128x128xf32>
    %87 = arith.truncf %86 : vector<128x128xf32> to vector<128x128xbf16>
    %c0_38 = arith.constant 0 : index
    %c0_39 = arith.constant 0 : index
    %88 = vector.load %arg14[%c0_38, %c0_39] : memref<128x128xbf16, #tpu.memory_space<vmem>>, vector<128x128xbf16>
    %cst_40 = arith.constant dense<0.000000e+00> : vector<128x128xf32>
    %89 = tpu.matmul %87, %88, %cst_40 {dimension_numbers = #tpu.dot_dimension_numbers<[1], [0], [0], [1], [0, 0, 1, 1], [], []>} : vector<128x128xbf16>, vector<128x128xbf16>, vector<128x128xf32> -> vector<128x128xf32>
    %c0_41 = arith.constant 0 : index
    %c0_42 = arith.constant 0 : index
    %90 = vector.load %arg15[%c0_41, %c0_42] : memref<1x128xf32, #tpu.memory_space<vmem>>, vector<1x128xf32>
    %91 = vector.broadcast %90 : vector<1x128xf32> to vector<128x128xf32>
    %92 = arith.addf %89, %91 : vector<128x128xf32>
    %c0_43 = arith.constant 0 : index
    %c0_44 = arith.constant 0 : index
    %93 = vector.load %arg16[%c0_43, %c0_44] : memref<128x128xf32, #tpu.memory_space<vmem>>, vector<128x128xf32>
    tpu.vector_store %arg16[%c0_43, %c0_44], %92 {strides = array<i32>} : memref<128x128xf32, #tpu.memory_space<vmem>>, vector<128x128xf32>,
    return
  }
  func.func @transform_0(%arg0: i32) -> (i32, i32) {
    %c0_i32 = arith.constant 0 : i32
    %c0_i32_0 = arith.constant 0 : i32
    return %arg0, %c0_i32 : i32, i32
  }
  func.func @transform_1(%arg0: i32) -> (i32, i32) {
    %c0_i32 = arith.constant 0 : i32
    %c0_i32_0 = arith.constant 0 : i32
    return %arg0, %c0_i32 : i32, i32
  }
  func.func @transform_2(%arg0: i32) -> (i32, i32) {
    %c0_i32 = arith.constant 0 : i32
    %c0_i32_0 = arith.constant 0 : i32
    return %arg0, %c0_i32 : i32, i32
  }
  func.func @transform_3(%arg0: i32) -> (i32, i32) {
    %c0_i32 = arith.constant 0 : i32
    %c0_i32_0 = arith.constant 0 : i32
    %c0_i32_1 = arith.constant 0 : i32
    return %c0_i32, %c0_i32_0 : i32, i32
  }
  func.func @transform_4(%arg0: i32) -> (i32, i32) {
    %c0_i32 = arith.constant 0 : i32
    %c0_i32_0 = arith.constant 0 : i32
    %c0_i32_1 = arith.constant 0 : i32
    return %c0_i32, %c0_i32_0 : i32, i32
  }
  func.func @transform_5(%arg0: i32) -> (i32, i32) {
    %c0_i32 = arith.constant 0 : i32
    %c0_i32_0 = arith.constant 0 : i32
    %c0_i32_1 = arith.constant 0 : i32
    return %c0_i32, %c0_i32_0 : i32, i32
  }
  func.func @transform_6(%arg0: i32) -> (i32, i32) {
    %c0_i32 = arith.constant 0 : i32
    %c0_i32_0 = arith.constant 0 : i32
    %c0_i32_1 = arith.constant 0 : i32
    return %c0_i32, %c0_i32_0 : i32, i32
  }
  func.func @transform_7(%arg0: i32) -> (i32, i32) {
    %c0_i32 = arith.constant 0 : i32
    %c0_i32_0 = arith.constant 0 : i32
    %c0_i32_1 = arith.constant 0 : i32
    return %c0_i32, %c0_i32_0 : i32, i32
  }
  func.func @transform_8(%arg0: i32) -> (i32, i32) {
    %c0_i32 = arith.constant 0 : i32
    %c0_i32_0 = arith.constant 0 : i32
    %c0_i32_1 = arith.constant 0 : i32
    return %c0_i32, %c0_i32_0 : i32, i32
  }
  func.func @transform_9(%arg0: i32) -> (i32, i32) {
    %c0_i32 = arith.constant 0 : i32
    %c0_i32_0 = arith.constant 0 : i32
    %c0_i32_1 = arith.constant 0 : i32
    return %c0_i32, %c0_i32_0 : i32, i32
  }
  func.func @transform_10(%arg0: i32) -> (i32, i32) {
    %c0_i32 = arith.constant 0 : i32
    %c0_i32_0 = arith.constant 0 : i32
    %c0_i32_1 = arith.constant 0 : i32
    return %c0_i32, %c0_i32_0 : i32, i32
  }
  func.func @transform_11(%arg0: i32) -> (i32, i32) {
    %c0_i32 = arith.constant 0 : i32
    %c0_i32_0 = arith.constant 0 : i32
    %c0_i32_1 = arith.constant 0 : i32
    return %c0_i32, %c0_i32_0 : i32, i32
  }
  func.func @transform_12(%arg0: i32) -> (i32, i32) {
    %c0_i32 = arith.constant 0 : i32
    %c0_i32_0 = arith.constant 0 : i32
    %c0_i32_1 = arith.constant 0 : i32
    return %c0_i32, %c0_i32_0 : i32, i32
  }
  func.func @transform_13(%arg0: i32) -> (i32, i32) {
    %c0_i32 = arith.constant 0 : i32
    %c0_i32_0 = arith.constant 0 : i32
    %c0_i32_1 = arith.constant 0 : i32
    return %c0_i32, %c0_i32_0 : i32, i32
  }
  func.func @transform_14(%arg0: i32) -> (i32, i32) {
    %c0_i32 = arith.constant 0 : i32
    %c0_i32_0 = arith.constant 0 : i32
    %c0_i32_1 = arith.constant 0 : i32
    return %c0_i32, %c0_i32_0 : i32, i32
  }
  func.func @transform_15(%arg0: i32) -> (i32, i32) {
    %c0_i32 = arith.constant 0 : i32
    %c0_i32_0 = arith.constant 0 : i32
    return %arg0, %c0_i32 : i32, i32
  }
}

</mosaic_0001>

<bundles_post_ra>
// kernel: tpu_custom_call.1
= control target key start
LH: loop header
LB: loop body
LE: loop exit
PB: predicated region body
PF: predicated region fallthrough
CT: control target
= control target key end

     0   :  { %s4886_s0 = inlined_call_operand.vmem [shape: f32[256,2], index: 0, kind: input, shape index: {}]   ;;  %s4887_s1 = inlined_call_operand.vmem [shape: f32[256,1], index: 1, kind: input, shape index: {}]   ;;  %s4888_s2 = inlined_call_operand.vmem [shape: f32[256,1], index: 2, kind: input, shape index: {}]   ;;  %s4889_s3 = inlined_call_operand.vmem [shape: f32[2,128], index: 3, kind: input, shape index: {}]   ;;  %s4890_s4 = inlined_call_operand.vmem [shape: f32[1,128], index: 4, kind: input, shape index: {}]   ;;  %s4891_s5 = inlined_call_operand.vmem [shape: bf16[128,768], index: 5, kind: input, shape index: {}]   ;;  %s4892_s6 = inlined_call_operand.vmem [shape: f32[1,768], index: 6, kind: input, shape index: {}]   ;;  %s4893_s7 = inlined_call_operand.vmem [shape: f32[2,128], index: 7, kind: input, shape index: {}]   ;;  %s4894_s8 = inlined_call_operand.vmem [shape: f32[1,128], index: 8, kind: input, shape index: {}]   ;;  %s4895_s9 = inlined_call_operand.vmem [shape: bf16[128,128], index: 9, kind: input, shape index: {}]   ;;  %s4896_s10 = inlined_call_operand.vmem [shape: f32[1,128], index: 10, kind: input, shape index: {}]   ;;  %s4897_s11 = inlined_call_operand.vmem [shape: bf16[128,128], index: 11, kind: input, shape index: {}]   ;;  %s4898_s12 = inlined_call_operand.vmem [shape: f32[1,128], index: 12, kind: input, shape index: {}]   ;;  %s4899_s13 = inlined_call_operand.vmem [shape: bf16[128,128], index: 13, kind: input, shape index: {}]   ;;  %s4900_s14 = inlined_call_operand.vmem [shape: f32[1,128], index: 14, kind: input, shape index: {}]   ;;  %s4901_s15 = inlined_call_operand.hbm [shape: f32[256,128], index: 15, kind: output, shape index: {}]  }
   0x1   :  { %4907 = sst [smem:[#allocation29_spill]] %s4887_s1 }
   0x2   :  { %4908 = sst [smem:[#allocation30_spill]] %s4888_s2 }
   0x3   :  { %20 = vsyncpa [#allocation3], 0 }
   0x4   :  { %22 = vsyncpa [#allocation3 + $0x1], 0  ;;  %s3659_s18 = smov 0   ;;  %s3661_s19 = smov 0  }
   0x5   :  { %s3663_s20 = smov 0   ;;  %s3665_s21 = smov 0  }
   0x6 LB: > { %4909 = sst [smem:[#allocation5_spill]] %s3560_s18  ;;  %s3680_s22 = sadd.s32 4294967295, %s3572_s21   ;;  %s3572_s21 = sphi %s3665_s21, %s4958_s21   ;;  %s3568_s20 = sphi %s3663_s20, %s4960_s20   ;;  %s3564_s19 = sphi %s3661_s19, %s4962_s19   ;;  %s3560_s18 = sphi %s3659_s18, %s4961_s18  }
   0x7   : > { %4910 = sst [smem:[#allocation6_spill]] %s3568_s20  ;;  %s2846_s23 = sadd.s32 4294967294, %s3572_s21  }
   0x8   : > { %s3684_s24 = sadd.s32 1, %s3572_s21   ;;  %s365_s25 = sadd.s32 1, %s3568_s20 }
   0x9   : > { %4911 = sst [smem:[#allocation7_spill]] %s3684_s24  ;;  %s362_s26 = ssub.s32 %s3572_s21, %s3684_s24 }
   0xa   : > { %p375_p0 = scmp.ne.s32.totalorder %s3568_s20, %s3564_s19  ;;  %p363_p1 = scmp.eq.s32.totalorder %s362_s26, 0 }
   0xb   : > { %p376_p2 = scmp.eq.s32.totalorder %s3680_s22, 1  ;;  %p381_p3 = scmp.ne.s32.totalorder %s3564_s19, %s3560_s18 }
   0xc   : > { %p382_p4 = scmp.eq.s32.totalorder %s2846_s23, 1  ;;  %p2849_p7 = scmp.ge.s32.totalorder %s3572_s21, 1 }
   0xd   : > { %s3695_s27 = scalar_select %p363_p1, %s3568_s20, %s365_s25  }
   0xe   : > { %p3697_p5 = por %p376_p2, %p375_p0  ;;  %p3701_p6 = por %p382_p4, %p381_p3 }
   0xf   : > { %4912 = sst [smem:[#allocation8_spill]] %s3695_s27  ;;  %p463_p8 = scmp.lt.s32.totalorder %s3572_s21, 3 }
  0x10   : > { %s4914_s29 = scalar_select %p3701_p6, 1, 0 }
  0x11   : > { %p464_p9 = pnand %p2849_p7, %p463_p8 }
  0x12   : > { %4915 = sst [smem:[#allocation9_spill]] %s4914_s29 }
  0x13   : > { %467 = sbr.rel (%p464_p9) target bundleno = 1256 (0x4e8), region = 80 }
  0x1a   : > { %s2851_s30 = sshll.u32 %s3680_s22, 4  ;;  %v3574_v0 = vmov 0   ;;  %s4916_s2 = sld [smem:[#allocation30_spill]]  ;;  %v3157_v12 = vld [vmem:[%s4891_s5 + $0x4] ss:$24 sps:$4 sm:$0xff]  }
  0x1b   : > { %3148 = vset.pattern.permute.xlu1 %v3574_v0  ;;  %3147 = vset.pattern.permute.xlu0 %v3574_v0  ;;  %p522_p10 = scmp.lt.s32.totalorder %s2851_s30, 31  ;;  %s4917_s1 = sld [smem:[#allocation29_spill]]  ;;  %v3159_v13 = vld [vmem:[%s4891_s5 + $0xc] ss:$24 sps:$4 sm:$0xff]   ;;  %v3161_v14 = vld [vmem:[%s4891_s5] ss:$24 sps:$4 sm:$0xff]  }
  0x1c   : > { %1270 = vmatprep.mubr.bf16.mxu0 %v3574_v0  ;;  %1383 = vmatprep.mubr.bf16.mxu1 %v3574_v0  ;;  %v3162_v15 = vld [vmem:[%s4891_s5 + $0x8] ss:$24 sps:$4 sm:$0xff]   ;;  %v3163_v17 = vld [vmem:[%s4891_s5 + $0x34] ss:$24 sps:$4 sm:$0xff]   ;;  %v3168_v20 = vld [vmem:[%s4891_s5 + $0x38] ss:$24 sps:$4 sm:$0xff]  }
  0x1d   : > { %s4964_s30 = smov (!%p522_p10, %s2851_s30), 31  ;;  %1238 = vmatprep.subr.bf16.mxu0 %v3157_v12  ;;  %v3165_v18 = vld [vmem:[%s4891_s5 + $0x3c] ss:$24 sps:$4 sm:$0xff]   ;;  %1351 = vmatprep.subr.bf16.mxu1 %v3159_v13  ;;  %v3167_v19 = vld [vmem:[%s4891_s5 + $0x30] ss:$24 sps:$4 sm:$0xff]  }
  0x1e   : > { %s3712_s16 = sshll.u32 %s4964_s30, 3  ;;  %1239 = vmatpush1.bf16.msra.mxu0 %v3161_v14  ;;  %1352 = vmatpush1.bf16.msra.mxu1 %v3162_v15  ;;  %v3169_v23 = vld [vmem:[%s4891_s5 + $0x64] ss:$24 sps:$4 sm:$0xff]   ;;  %v3173_v25 = vld [vmem:[%s4891_s5 + $0x60] ss:$24 sps:$4 sm:$0xff]   ;;  %s3576_s30 = smov [#allocation2]  }
  0x1f   : > { %1240 = vmatprep.subr.bf16.mxu0 %v3163_v17  ;;  %v3171_v24 = vld [vmem:[%s4891_s5 + $0x6c] ss:$24 sps:$4 sm:$0xff]   ;;  %1353 = vmatprep.subr.bf16.mxu1 %v3165_v18  ;;  %v3174_v26 = vld [vmem:[%s4891_s5 + $0x68] ss:$24 sps:$4 sm:$0xff]   ;;  %v3177_v30 = vld [vmem:[%s4891_s5 + $0x9c] ss:$24 sps:$4 sm:$0xff]   ;;  %s3858_s29 = scalar_lea.vmem %s4886_s0, %s3712_s16 }
  0x20   : > { %s3718_s25 = scalar_lea.vmem %s4916_s2, %s3712_s16  ;;  %v3175_v29 = vld [vmem:[%s4891_s5 + $0x94] ss:$24 sps:$4 sm:$0xff]   ;;  %v3179_v31 = vld [vmem:[%s4891_s5 + $0x90] ss:$24 sps:$4 sm:$0xff]   ;;  %v3181_v35 = vld [vmem:[%s4891_s5 + $0xc4] ss:$24 sps:$4 sm:$0xff]  }
  0x21   : > { %s3724_s20 = scalar_lea.vmem %s4917_s1, %s3712_s16  ;;  %v557_v1 = vld [vmem:[%s3718_s25] sm:$0xff]  ;;  %v558_v3 = vld [vmem:[%s3718_s25 + $0x8] sm:$0xff]  ;;  %v560_v7 = vld [vmem:[%s3718_s25 + $0x18] sm:$0xff]  ;;  %s518_s1 = sand.u32 1, %s3564_s19  }
  0x22   : > { %v541_v2 = vld [vmem:[%s3724_s20] sm:$0xff]  ;;  %677 = vperm.xlu1 %3148, %v557_v1   ;;  %v542_v4 = vld [vmem:[%s3724_s20 + $0x8] sm:$0xff]  ;;  %v544_v5 = vld [vmem:[%s3724_s20 + $0x18] sm:$0xff]  ;;  %1241 = vmatpush1.bf16.msra.mxu0 %v3167_v19  ;;  %s2850_s2 = sshll.u32 %s518_s1, 7  ;;  %s2943_s16 = sshll.u32 %s3680_s22, 11 }
  0x23   : > { %576 = vperm.xlu0 %3147, %v541_v2   ;;  %v543_v6 = vld [vmem:[%s3724_s20 + $0x10] sm:$0xff]  ;;  %v546_v9 = vld [vmem:[%s3724_s20 + $0x28] sm:$0xff]  ;;  %v545_v10 = vld [vmem:[%s3724_s20 + $0x20] sm:$0xff]  ;;  %1354 = vmatpush1.bf16.msra.mxu1 %v3168_v20  ;;  %s4836_s26 = scalar_lea.hbm %s4901_s15, %s2943_s16  ;;  %s4845_s22 = scalar_lea.sflag [#allocation3], %s518_s1 }
  0x24   : > { %v559_v8 = vld [vmem:[%s3718_s25 + $0x10] sm:$0xff]  ;;  %v562_v11 = vld [vmem:[%s3718_s25 + $0x28] sm:$0xff]  ;;  %v561_v16 = vld [vmem:[%s3718_s25 + $0x20] sm:$0xff]  ;;  %1242 = vmatprep.subr.bf16.mxu0 %v3169_v23  ;;  %1355 = vmatprep.subr.bf16.mxu1 %v3171_v24  ;;  %s3514_s17 = sshll.u32 %s3576_s30, 4  ;;  %s3515_s17 = int_to_ptr.vmem [resolvable:$false] %s3514_s17 }
  0x25   : > { %v548_v21 = vld [vmem:[%s3724_s20 + $0x38] sm:$0xff]  ;;  %v547_v22 = vld [vmem:[%s3724_s20 + $0x30] sm:$0xff]  ;;  %v550_v33 = vld [vmem:[%s3724_s20 + $0x48] sm:$0xff] }
  0x26   : > { %682 = vperm.xlu1 %3148, %v558_v3   ;;  %v564_v27 = vld [vmem:[%s3718_s25 + $0x38] sm:$0xff]  ;;  %v563_v28 = vld [vmem:[%s3718_s25 + $0x30] sm:$0xff]  ;;  %1243 = vmatpush1.bf16.msra.mxu0 %v3173_v25  ;;  %v549_v34 = vld [vmem:[%s3724_s20 + $0x40] sm:$0xff] }
  0x27   : > { %581 = vperm.xlu0 %3147, %v542_v4   ;;  %v3180_v32 = vld [vmem:[%s4891_s5 + $0x98] ss:$24 sps:$4 sm:$0xff]   ;;  %1356 = vmatpush1.bf16.msra.mxu1 %v3174_v26  ;;  %v3183_v36 = vld [vmem:[%s4891_s5 + $0xcc] ss:$24 sps:$4 sm:$0xff]   ;;  %v3186_v38 = vld [vmem:[%s4891_s5 + $0xc8] ss:$24 sps:$4 sm:$0xff]  }
  0x28   : > { %1244 = vmatprep.subr.bf16.mxu0 %v3175_v29  ;;  %1357 = vmatprep.subr.bf16.mxu1 %v3177_v30  ;;  %v3185_v37 = vld [vmem:[%s4891_s5 + $0xc0] ss:$24 sps:$4 sm:$0xff]   ;;  %v566_v39 = vld [vmem:[%s3718_s25 + $0x48] sm:$0xff]  ;;  %v3189_v42 = vld [vmem:[%s4891_s5 + $0xfc] ss:$24 sps:$4 sm:$0xff]  }
  0x29   : > { %v565_v40 = vld [vmem:[%s3718_s25 + $0x40] sm:$0xff]  ;;  %v3187_v41 = vld [vmem:[%s4891_s5 + $0xf4] ss:$24 sps:$4 sm:$0xff]   ;;  %v3191_v43 = vld [vmem:[%s4891_s5 + $0xf0] ss:$24 sps:$4 sm:$0xff]  }
  0x2a   : > { %591 = vperm.xlu1 %3148, %v544_v5   ;;  %1245 = vmatpush1.bf16.msra.mxu0 %v3179_v31  ;;  %v3192_v44 = vld [vmem:[%s4891_s5 + $0xf8] ss:$24 sps:$4 sm:$0xff]   ;;  %v3193_v47 = vld [vmem:[%s4891_s5 + $0x124] ss:$24 sps:$4 sm:$0xff]   ;;  %v3198_v50 = vld [vmem:[%s4891_s5 + $0x128] ss:$24 sps:$4 sm:$0xff]  }
  0x2b   : > { %586 = vperm.xlu0 %3147, %v543_v6   ;;  %1358 = vmatpush1.bf16.msra.mxu1 %v3180_v32  ;;  %v552_v45 = vld [vmem:[%s3724_s20 + $0x58] sm:$0xff]  ;;  %v551_v46 = vld [vmem:[%s3724_s20 + $0x50] sm:$0xff]  ;;  %v3195_v48 = vld [vmem:[%s4891_s5 + $0x12c] ss:$24 sps:$4 sm:$0xff]  }
  0x2c   : > { %1246 = vmatprep.subr.bf16.mxu0 %v3181_v35  ;;  %1359 = vmatprep.subr.bf16.mxu1 %v3183_v36  ;;  %v3197_v49 = vld [vmem:[%s4891_s5 + $0x120] ss:$24 sps:$4 sm:$0xff]   ;;  %v567_v52 = vld [vmem:[%s3718_s25 + $0x50] sm:$0xff]  ;;  %v554_v57 = vld [vmem:[%s3724_s20 + $0x68] sm:$0xff] }
  0x2d   : > { %v568_v51 = vld [vmem:[%s3718_s25 + $0x58] sm:$0xff]  ;;  %v3199_v53 = vld [vmem:[%s4891_s5 + $0x154] ss:$24 sps:$4 sm:$0xff]   ;;  %v3203_v55 = vld [vmem:[%s4891_s5 + $0x150] ss:$24 sps:$4 sm:$0xff]  }
  0x2e   : > { %692 = vperm.xlu1 %3148, %v560_v7   ;;  %1247 = vmatpush1.bf16.msra.mxu0 %v3185_v37  ;;  %v3201_v54 = vld [vmem:[%s4891_s5 + $0x15c] ss:$24 sps:$4 sm:$0xff]   ;;  %v3204_v56 = vld [vmem:[%s4891_s5 + $0x158] ss:$24 sps:$4 sm:$0xff]   ;;  %v553_v58 = vld [vmem:[%s3724_s20 + $0x60] sm:$0xff]  ;;  %v3575_v7 = vmov 1  }
  0x2f   : > { %687 = vperm.xlu0 %3147, %v559_v8   ;;  %1360 = vmatpush1.bf16.msra.mxu1 %v3186_v38  ;;  %v570_v59 = vld [vmem:[%s3718_s25 + $0x68] sm:$0xff]  ;;  %v569_v60 = vld [vmem:[%s3718_s25 + $0x60] sm:$0xff]  ;;  %v556_v61 = vld [vmem:[%s3724_s20 + $0x78] sm:$0xff] }
  0x30   : > { %1248 = vmatprep.subr.bf16.mxu0 %v3187_v41  ;;  %1361 = vmatprep.subr.bf16.mxu1 %v3189_v42  ;;  %v555_v62 = vld [vmem:[%s3724_s20 + $0x70] sm:$0xff]  ;;  %v572_v63 = vld [vmem:[%s3718_s25 + $0x78] sm:$0xff]  ;;  %v1578_v2 = vld [vmem:[%s3858_s29 + $0x8] sm:$0xff]  ;;  %s4816_s20 = scalar_lea.vmem [#allocation2], %s2850_s2  ;;  %s3516_s2 = scalar_lea.vmem %s3515_s17, 4096 }
  0x31   : > { %v571_v1 = vld [vmem:[%s3718_s25 + $0x70] sm:$0xff]  ;;  %v1577_v3 = vld [vmem:[%s3858_s29] sm:$0xff]  ;;  %v1580_v4 = vld [vmem:[%s3858_s29 + $0x18] sm:$0xff]  ;;  %s2760_s25 = sshll.u32 %s4816_s20, 4  ;;  %s4838_s25 = int_to_ptr.vmem [resolvable:$true] %s2760_s25 }
  0x32   : > { %601 = vperm.xlu1 %3148, %v546_v9   ;;  %1249 = vmatpush1.bf16.msra.mxu0 %v3191_v43  ;;  %v1579_v5 = vld [vmem:[%s3858_s29 + $0x10] sm:$0xff]  ;;  %v1582_v6 = vld [vmem:[%s3858_s29 + $0x28] sm:$0xff]  ;;  %v1584_v13 = vld [vmem:[%s3858_s29 + $0x38] sm:$0xff]  ;;  %s3510_s27 = scalar_lea.vmem %s4838_s25, 2048  ;;  %p3517_p0 = scmp.lt.s32.totalorder %s4838_s25, %s3515_s17 }
  0x33   : > { %596 = vperm.xlu0 %3147, %v545_v10   ;;  %1362 = vmatpush1.bf16.msra.mxu1 %v3192_v44  ;;  %v1586_v8 = vld [vmem:[%s3858_s29 + $0x48] sm:$0xff]  ;;  %v1583_v12 = vld [vmem:[%s3858_s29 + $0x30] sm:$0xff]  ;;  %v1585_v14 = vld [vmem:[%s3858_s29 + $0x40] sm:$0xff]  ;;  %p3511_p11 = scmp.ne.s32.totalorder %s4838_s25, %s3510_s27  ;;  %p3518_p1 = scmp.lt.s32.totalorder %s3516_s2, %s3510_s27 }
  0x34   : > { %1250 = vmatprep.subr.bf16.mxu0 %v3193_v47  ;;  %1363 = vmatprep.subr.bf16.mxu1 %v3195_v48  ;;  %v3207_v9 = vld [vmem:[%s4891_s5 + $0x14] ss:$24 sps:$4 sm:$0xff]   ;;  %v1588_v15 = vld [vmem:[%s3858_s29 + $0x58] sm:$0xff]  ;;  %v1589_v17 = vld [vmem:[%s3858_s29 + $0x60] sm:$0xff] }
  0x35   : > { %v1590_v10 = vld [vmem:[%s3858_s29 + $0x68] sm:$0xff]  ;;  %v1592_v18 = vld [vmem:[%s3858_s29 + $0x78] sm:$0xff]  ;;  %v3888_v19 = vld [vmem:[%s4889_s3 + $0x1] ss:$0 sm:$0xff]  ;;  %p3512_p12 = pnand %p3511_p11, %p3697_p5  ;;  %p3519_p2 = por %p3518_p1, %p3517_p0 }
  0x36   : > { %702 = vperm.xlu1 %3148, %v562_v11   ;;  %1251 = vmatpush1.bf16.msra.mxu0 %v3197_v49  ;;  %v1581_v11 = vld [vmem:[%s3858_s29 + $0x20] sm:$0xff]  ;;  %v1591_v23 = vld [vmem:[%s3858_s29 + $0x70] sm:$0xff] }
  0x37   : > { %697 = vperm.xlu0 %3147, %v561_v16   ;;  %1364 = vmatpush1.bf16.msra.mxu1 %v3198_v50  ;;  %v1587_v16 = vld [vmem:[%s3858_s29 + $0x50] sm:$0xff]  ;;  %v3893_v20 = vld [vmem:[%s4889_s3] ss:$0 sm:$0xff]  ;;  %p3513_p13 = pneg %p3512_p12 }
  0x38   : > { %1252 = vmatprep.subr.bf16.mxu0 %v3199_v53  ;;  %1365 = vmatprep.subr.bf16.mxu1 %v3201_v54  ;;  %v3901_v26 = vld [vmem:[%s4890_s4] ss:$0 sm:$0xff] }
  0x39   : > { %p3520_p3 = pnand %p3519_p2, %p3513_p13 }
  0x3a   : > { %611 = vperm.xlu1 %3148, %v548_v21   ;;  %1253 = vmatpush1.bf16.msra.mxu0 %v3203_v55 }
  0x3b   : > { %606 = vperm.xlu0 %3147, %v547_v22   ;;  %1366 = vmatpush1.bf16.msra.mxu1 %v3204_v56 }
  0x3c   : > { %1464 = vmatprep.subr.bf16.mxu0 %v3207_v9 }
  0x3e   : > { %712 = vperm.xlu1 %3148, %v564_v27  }
  0x3f   : > { %707 = vperm.xlu0 %3147, %v563_v28  }
  0x42   : > { %621 = vperm.xlu1 %3148, %v550_v33  }
  0x43   : > { %616 = vperm.xlu0 %3147, %v549_v34  }
  0x46   : > { %722 = vperm.xlu1 %3148, %v566_v39  }
  0x47   : > { %717 = vperm.xlu0 %3147, %v565_v40  }
  0x4a   : > { %631 = vperm.xlu1 %3148, %v552_v45  }
  0x4b   : > { %626 = vperm.xlu0 %3147, %v551_v46  }
  0x4e   : > { %732 = vperm.xlu1 %3148, %v568_v51  }
  0x4f   : > { %727 = vperm.xlu0 %3147, %v567_v52  }
  0x52   : > { %641 = vperm.xlu1 %3148, %v554_v57  }
  0x53   : > { %636 = vperm.xlu0 %3147, %v553_v58  }
  0x56   : > { %742 = vperm.xlu1 %3148, %v570_v59  }
  0x57   : > { %737 = vperm.xlu0 %3147, %v569_v60  }
  0x5a   : > { %651 = vperm.xlu1 %3148, %v556_v61  }
  0x5b   : > { %646 = vperm.xlu0 %3147, %v555_v62  }
  0x5e   : > { %752 = vperm.xlu1 %3148, %v572_v63  }
  0x5f   : > { %747 = vperm.xlu0 %3147, %v571_v1  }
  0x62   : > { %1602 = vperm.xlu1 %3148, %v1578_v2  }
  0x63   : > { %1597 = vperm.xlu0 %3147, %v1577_v3  }
  0x66   : > { %1612 = vperm.xlu1 %3148, %v1580_v4  }
  0x67   : > { %1607 = vperm.xlu0 %3147, %v1579_v5  }
  0x6a   : > { %3149 = vset.pattern.permute.xlu1 %v3575_v7 }
  0x6b   : > { %1622 = vperm.xlu0 %3147, %v1582_v6   ;;  %1723 = vperm.xlu1 %3149, %v1578_v2  }
  0x6f   : > { %1642 = vperm.xlu0 %3147, %v1586_v8   ;;  %1727 = vperm.xlu1 %3149, %v1579_v5  }
  0x73   : > { %1662 = vperm.xlu0 %3147, %v1590_v10   ;;  %3150 = vset.pattern.permute.xlu1 %v3574_v0 }
  0x74   : > { %1617 = vperm.xlu1 %3150, %v1581_v11  }
  0x77   : > { %3155 = vset.pattern.permute.xlu0 %v3575_v7 }
  0x78   : > { %1719 = vperm.xlu0 %3155, %v1577_v3   ;;  %1627 = vperm.xlu1 %3150, %v1583_v12  }
  0x7c   : > { %1731 = vperm.xlu0 %3155, %v1580_v4   ;;  %1632 = vperm.xlu1 %3150, %v1584_v13  }
  0x80   : > { %1735 = vperm.xlu0 %3155, %v1581_v11   ;;  %3151 = vset.pattern.permute.xlu1 %v3575_v7 }
  0x81   : > { %1739 = vperm.xlu1 %3151, %v1582_v6  }
  0x84   : > { %1747 = vperm.xlu0 %3155, %v1584_v13  }
  0x85   : > { %1743 = vperm.xlu1 %3151, %v1583_v12  }
  0x88   : > { %1751 = vperm.xlu0 %3155, %v1585_v14  }
  0x89   : > { %3152 = vset.pattern.permute.xlu1 %v3574_v0 }
  0x8a   : > { %1637 = vperm.xlu1 %3152, %v1585_v14  }
  0x8c   : > { %1763 = vperm.xlu0 %3155, %v1588_v15  }
  0x8e   : > { %1647 = vperm.xlu1 %3152, %v1587_v16  }
  0x90   : > { %1767 = vperm.xlu0 %3155, %v1589_v17  }
  0x92   : > { %1652 = vperm.xlu1 %3152, %v1588_v15  }
  0x94   : > { %1779 = vperm.xlu0 %3155, %v1592_v18  }
  0x96   : > { %3153 = vset.pattern.permute.xlu1 %v3575_v7 }
  0x97   : > { %1755 = vperm.xlu1 %3153, %v1586_v8  }
  0x9b   : > { %1759 = vperm.xlu1 %3153, %v1587_v16  }
  0x9f   : > { %3154 = vset.pattern.permute.xlu1 %v3574_v0 }
  0xa0   : > { %1657 = vperm.xlu1 %3154, %v1589_v17  }
  0xa1   : > { %v678_v21 = vpop.permute.xlu1 %677 }
  0xa2   : > { %v577_v22 = vpop.permute.xlu0 %576  ;;  %v759_v24 = vmul.f32 %v3888_v19, %v678_v21 }
  0xa3   : > { %v658_v25 = vmul.f32 %v3893_v20, %v577_v22 }
  0xa4   : > { %1667 = vperm.xlu1 %3154, %v1591_v23  }
  0xa5   : > { %v775_v27 = vadd.f32 %v759_v24, %v658_v25  ;;  %v683_v28 = vpop.permute.xlu1 %682 }
  0xa6   : > { %v582_v29 = vpop.permute.xlu0 %581  ;;  %v760_v31 = vmul.f32 %v3888_v19, %v683_v28 }
  0xa7   : > { %v3904_v30 = vadd.f32 %v3901_v26, %v775_v27  ;;  %v659_v32 = vmul.f32 %v3893_v20, %v582_v29 }
  0xa8   : > { %1672 = vperm.xlu1 %3154, %v1592_v18  }
  0xa9   : > { %v814_v33 = vsub.f32 0.0, %v3904_v30  ;;  %v776_v34 = vadd.f32 %v760_v31, %v659_v32  ;;  %v592_v35 = vpop.permute.xlu1 %591 }
  0xaa   : > { %v587_v36 = vpop.permute.xlu0 %586  ;;  %v661_v40 = vmul.f32 %v3893_v20, %v592_v35 }
  0xab   : > { %v830_v37 = vmul.f32 1.442695, %v814_v33  ;;  %v3910_v38 = vadd.f32 %v3901_v26, %v776_v34  ;;  %v660_v44 = vmul.f32 %v3893_v20, %v587_v36 }
  0xac   : > { %3156 = vset.pattern.permute.xlu1 %v3575_v7 }
  0xad   : > { %3253 = vpow2.f32 %v830_v37  ;;  %v815_v39 = vsub.f32 0.0, %v3910_v38  ;;  %v693_v41 = vpop.permute.xlu1 %692  ;;  %1771 = vperm.xlu1 %3156, %v1590_v10  }
  0xae   : > { %v688_v42 = vpop.permute.xlu0 %687  ;;  %v762_v45 = vmul.f32 %v3888_v19, %v693_v41 }
  0xaf   : > { %v832_v43 = vmul.f32 1.442695, %v815_v39  ;;  %v761_v46 = vmul.f32 %v3888_v19, %v688_v42 }
  0xb0   : > { %v778_v47 = vadd.f32 %v762_v45, %v661_v40 }
  0xb1   : > { %3255 = vpow2.f32 %v832_v43  ;;  %v777_v48 = vadd.f32 %v761_v46, %v660_v44  ;;  %v602_v49 = vpop.permute.xlu1 %601  ;;  %1775 = vperm.xlu1 %3156, %v1591_v23  }
  0xb2   : > { %v597_v50 = vpop.permute.xlu0 %596  ;;  %v3919_v51 = vadd.f32 %v3901_v26, %v778_v47  ;;  %v663_v55 = vmul.f32 %v3893_v20, %v602_v49 }
  0xb3   : > { %v3922_v52 = vadd.f32 %v3901_v26, %v777_v48  ;;  %v662_v56 = vmul.f32 %v3893_v20, %v597_v50 }
  0xb4   : > { %v817_v53 = vsub.f32 0.0, %v3919_v51 }
  0xb5   : > { %v816_v54 = vsub.f32 0.0, %v3922_v52  ;;  %v703_v57 = vpop.permute.xlu1 %702 }
  0xb6   : > { %v698_v58 = vpop.permute.xlu0 %697  ;;  %v836_v60 = vmul.f32 1.442695, %v817_v53  ;;  %v764_v62 = vmul.f32 %v3888_v19, %v703_v57 }
  0xb7   : > { %v3254_v59 = vpop.eup %3253  ;;  %v834_v61 = vmul.f32 1.442695, %v816_v54  ;;  %v763_v63 = vmul.f32 %v3888_v19, %v698_v58 }
  0xb8   : > { %v862_v1 = vadd.f32 1.0, %v3254_v59  ;;  %3257 = vpow2.f32 %v836_v60  ;;  %v780_v2 = vadd.f32 %v764_v62, %v663_v55 }
  0xb9   : > { %v779_v3 = vadd.f32 %v763_v63, %v662_v56  ;;  %v612_v4 = vpop.permute.xlu1 %611  ;;  %3259 = vpow2.f32 %v834_v61  ;;  %v3210_v63 = vld [vmem:[%s4891_s5 + $0x44] ss:$24 sps:$4 sm:$0xff]  }
  0xba   : > { %v607_v5 = vpop.permute.xlu0 %606  ;;  %v3931_v7 = vadd.f32 %v3901_v26, %v780_v2  ;;  %3261 = vrcp.f32 %v862_v1  ;;  %v665_v12 = vmul.f32 %v3893_v20, %v612_v4 }
  0xbb   : > { %v3256_v6 = vpop.eup %3255  ;;  %v3934_v8 = vadd.f32 %v3901_v26, %v779_v3  ;;  %v664_v13 = vmul.f32 %v3893_v20, %v607_v5 }
  0xbc   : > { %v863_v9 = vadd.f32 1.0, %v3256_v6  ;;  %v819_v10 = vsub.f32 0.0, %v3931_v7 }
  0xbd   : > { %v818_v11 = vsub.f32 0.0, %v3934_v8  ;;  %v713_v14 = vpop.permute.xlu1 %712 }
  0xbe   : > { %3263 = vrcp.f32 %v863_v9  ;;  %v708_v15 = vpop.permute.xlu0 %707  ;;  %v840_v16 = vmul.f32 1.442695, %v819_v10  ;;  %v766_v18 = vmul.f32 %v3888_v19, %v713_v14 }
  0xbf   : > { %v838_v17 = vmul.f32 1.442695, %v818_v11  ;;  %v765_v21 = vmul.f32 %v3888_v19, %v708_v15  ;;  %v3213_v15 = vld [vmem:[%s4891_s5 + $0x74] ss:$24 sps:$4 sm:$0xff]  }
  0xc0   : > { %3265 = vpow2.f32 %v840_v16  ;;  %v782_v22 = vadd.f32 %v766_v18, %v665_v12  ;;  %v3208_v12 = vld [vmem:[%s4891_s5 + $0x40] ss:$24 sps:$4 sm:$0xff]  }
  0xc1   : > { %v781_v23 = vadd.f32 %v765_v21, %v664_v13  ;;  %3267 = vpow2.f32 %v838_v17  ;;  %v622_v24 = vpop.permute.xlu1 %621 }
  0xc2   : > { %v617_v25 = vpop.permute.xlu0 %616  ;;  %v3258_v27 = vpop.eup %3257  ;;  %v3943_v28 = vadd.f32 %v3901_v26, %v782_v22  ;;  %v667_v36 = vmul.f32 %v3893_v20, %v622_v24 }
  0xc3   : > { %v3946_v29 = vadd.f32 %v3901_v26, %v781_v23  ;;  %v865_v31 = vadd.f32 1.0, %v3258_v27  ;;  %v3260_v32 = vpop.eup %3259  ;;  %v666_v37 = vmul.f32 %v3893_v20, %v617_v25 }
  0xc4   : > { %v821_v33 = vsub.f32 0.0, %v3943_v28  ;;  %v864_v35 = vadd.f32 1.0, %v3260_v32  ;;  %v3262_v41 = vpop.eup %3261 }
  0xc5   : > { %v820_v34 = vsub.f32 0.0, %v3946_v29  ;;  %3269 = vrcp.f32 %v865_v31  ;;  %v723_v39 = vpop.permute.xlu1 %722  ;;  %v894_v54 = vmul.f32 %v3262_v41, %v3904_v30 }
  0xc6   : > { %v718_v40 = vpop.permute.xlu0 %717  ;;  %v844_v42 = vmul.f32 1.442695, %v821_v33  ;;  %v768_v44 = vmul.f32 %v3888_v19, %v723_v39  ;;  %3271 = vrcp.f32 %v864_v35 }
  0xc7   : > { %v842_v43 = vmul.f32 1.442695, %v820_v34  ;;  %v767_v45 = vmul.f32 %v3888_v19, %v718_v40  ;;  %v3211_v34 = vld [vmem:[%s4891_s5 + $0x70] ss:$24 sps:$4 sm:$0xff]   ;;  %v3216_v40 = vld [vmem:[%s4891_s5 + $0xa4] ss:$24 sps:$4 sm:$0xff]  }
  0xc8   : > { %v3264_v46 = vpop.eup %3263  ;;  %3273 = vpow2.f32 %v844_v42  ;;  %v784_v47 = vadd.f32 %v768_v44, %v667_v36 }
  0xc9   : > { %v783_v48 = vadd.f32 %v767_v45, %v666_v37  ;;  %v895_v49 = vmul.f32 %v3264_v46, %v3910_v38  ;;  %3275 = vpow2.f32 %v842_v43  ;;  %v632_v50 = vpop.permute.xlu1 %631  ;;  %v3205_v38 = vld [vmem:[%s4891_s5 + $0x10] ss:$24 sps:$4 sm:$0xff]  }
  0xca   : > { %v627_v53 = vpop.permute.xlu0 %626  ;;  %v3266_v55 = vpop.eup %3265  ;;  %v3957_v56 = vadd.f32 %v3901_v26, %v784_v47  ;;  %v669_v1 = vmul.f32 %v3893_v20, %v632_v50  ;;  %v3214_v50 = vld [vmem:[%s4891_s5 + $0xa0] ss:$24 sps:$4 sm:$0xff]  }
  0xcb   : > { %v3960_v57 = vadd.f32 %v3901_v26, %v783_v48  ;;  %v3268_v58 = vpop.eup %3267  ;;  %v867_v59 = vadd.f32 1.0, %v3266_v55  ;;  %v3962_v60 = vpack.c.bf16 %v895_v49, %v894_v54  ;;  %v668_v10 = vmul.f32 %v3893_v20, %v627_v53 }
  0xcc   : > { %v866_v61 = vadd.f32 1.0, %v3268_v58  ;;  %v823_v62 = vsub.f32 0.0, %v3957_v56  ;;  %v3219_v58 = vld [vmem:[%s4891_s5 + $0xd4] ss:$24 sps:$4 sm:$0xff]  }
  0xcd   : > { %v822_v30 = vsub.f32 0.0, %v3960_v57  ;;  %3277 = vrcp.f32 %v867_v59  ;;  %1271 = vmatmul.mubr.bf16.vlgmr.msra.gmra.mrb[0].mxu0 %v3962_v60  ;;  %1384 = vmatmul.mubr.bf16.vlgmr.msra.gmra.mrb[0].mxu1 %v3962_v60  ;;  %v733_v2 = vpop.permute.xlu1 %732 }
  0xce   : > { %v728_v3 = vpop.permute.xlu0 %727  ;;  %3279 = vrcp.f32 %v866_v61  ;;  %v848_v4 = vmul.f32 1.442695, %v823_v62  ;;  %v770_v6 = vmul.f32 %v3888_v19, %v733_v2  ;;  %1280 = vmatprep.mubr.bf16.mxu0 %v3574_v0  ;;  %1393 = vmatprep.mubr.bf16.mxu1 %v3574_v0  ;;  %v3217_v2 = vld [vmem:[%s4891_s5 + $0xd0] ss:$24 sps:$4 sm:$0xff]  }
  0xcf   : > { %v846_v5 = vmul.f32 1.442695, %v822_v30  ;;  %v3270_v9 = vpop.eup %3269  ;;  %v769_v11 = vmul.f32 %v3888_v19, %v728_v3  ;;  %1465 = vmatpush1.bf16.msra.mxu0 %v3205_v38 }
  0xd0   : > { %3281 = vpow2.f32 %v848_v4  ;;  %v786_v13 = vadd.f32 %v770_v6, %v669_v1  ;;  %v897_v14 = vmul.f32 %v3270_v9, %v3919_v51  ;;  %1466 = vmatprep.subr.bf16.mxu0 %v3210_v63  ;;  %v3272_v16 = vpop.eup %3271  ;;  %v3222_v6 = vld [vmem:[%s4891_s5 + $0x104] ss:$24 sps:$4 sm:$0xff]  }
  0xd1   : > { %3283 = vpow2.f32 %v846_v5  ;;  %v785_v17 = vadd.f32 %v769_v11, %v668_v10  ;;  %v642_v18 = vpop.permute.xlu1 %641  ;;  %v896_v24 = vmul.f32 %v3272_v16, %v3922_v52 }
  0xd2   : > { %v637_v21 = vpop.permute.xlu0 %636  ;;  %v3274_v22 = vpop.eup %3273  ;;  %v3988_v23 = vadd.f32 %v3901_v26, %v786_v13  ;;  %v671_v52 = vmul.f32 %v3893_v20, %v642_v18  ;;  %v3220_v18 = vld [vmem:[%s4891_s5 + $0x100] ss:$24 sps:$4 sm:$0xff]  }
  0xd3   : > { %v3276_v25 = vpop.eup %3275  ;;  %v869_v27 = vadd.f32 1.0, %v3274_v22  ;;  %v3992_v51 = vadd.f32 %v3901_v26, %v785_v17  ;;  %1467 = vmatpush1.bf16.msra.mxu0 %v3208_v12  ;;  %v3995_v33 = vpack.c.bf16 %v897_v14, %v896_v24  ;;  %v670_v36 = vmul.f32 %v3893_v20, %v637_v21 }
  0xd4   : > { %v868_v31 = vadd.f32 1.0, %v3276_v25  ;;  %v825_v32 = vsub.f32 0.0, %v3988_v23  ;;  %1468 = vmatprep.subr.bf16.mxu0 %v3213_v15 }
  0xd5   : > { %3285 = vrcp.f32 %v869_v27  ;;  %v824_v35 = vsub.f32 0.0, %v3992_v51  ;;  %v743_v37 = vpop.permute.xlu1 %742  ;;  %1281 = vmatmul.mubr.bf16.gmra.mrb[4].mxu0 %v3995_v33  ;;  %1394 = vmatmul.mubr.bf16.gmra.mrb[4].mxu1 %v3995_v33 }
  0xd6   : > { %v738_v39 = vpop.permute.xlu0 %737  ;;  %3287 = vrcp.f32 %v868_v31  ;;  %v852_v41 = vmul.f32 1.442695, %v825_v32  ;;  %v772_v42 = vmul.f32 %v3888_v19, %v743_v37  ;;  %1290 = vmatprep.mubr.bf16.mxu0 %v3574_v0  ;;  %1403 = vmatprep.mubr.bf16.mxu1 %v3574_v0 }
  0xd7   : > { %v771_v43 = vmul.f32 %v3888_v19, %v738_v39  ;;  %v3278_v44 = vpop.eup %3277  ;;  %v850_v45 = vmul.f32 1.442695, %v824_v35  ;;  %1469 = vmatpush1.bf16.msra.mxu0 %v3211_v34 }
  0xd8   : > { %v3280_v46 = vpop.eup %3279  ;;  %3289 = vpow2.f32 %v852_v41  ;;  %v788_v47 = vadd.f32 %v772_v42, %v671_v52  ;;  %v899_v49 = vmul.f32 %v3278_v44, %v3931_v7  ;;  %1470 = vmatprep.subr.bf16.mxu0 %v3216_v40  ;;  %v3228_v52 = vld [vmem:[%s4891_s5 + $0x164] ss:$24 sps:$4 sm:$0xff]   ;;  %v3226_v41 = vld [vmem:[%s4891_s5 + $0x160] ss:$24 sps:$4 sm:$0xff]  }
  0xd9   : > { %v787_v48 = vadd.f32 %v771_v43, %v670_v36  ;;  %3291 = vpow2.f32 %v850_v45  ;;  %v652_v53 = vpop.permute.xlu1 %651  ;;  %v898_v55 = vmul.f32 %v3280_v46, %v3934_v8 }
  0xda   : > { %v647_v54 = vpop.permute.xlu0 %646  ;;  %v3282_v59 = vpop.eup %3281  ;;  %v4021_v38 = vadd.f32 %v3901_v26, %v788_v47  ;;  %v673_v3 = vmul.f32 %v3893_v20, %v652_v53 }
  0xdb   : > { %v4024_v7 = vadd.f32 %v3901_v26, %v787_v48  ;;  %v3284_v61 = vpop.eup %3283  ;;  %v871_v62 = vadd.f32 1.0, %v3282_v59  ;;  %v4026_v30 = vpack.c.bf16 %v899_v49, %v898_v55  ;;  %1471 = vmatpush1.bf16.msra.mxu0 %v3214_v50  ;;  %v672_v13 = vmul.f32 %v3893_v20, %v647_v54 }
  0xdc   : > { %v870_v63 = vadd.f32 1.0, %v3284_v61  ;;  %v827_v1 = vsub.f32 0.0, %v4021_v38  ;;  %1472 = vmatprep.subr.bf16.mxu0 %v3219_v58 }
  0xdd   : > { %v826_v8 = vsub.f32 0.0, %v4024_v7  ;;  %3293 = vrcp.f32 %v871_v62  ;;  %v753_v4 = vpop.permute.xlu1 %752  ;;  %1291 = vmatmul.mubr.bf16.gmra.mrb[8].mxu0 %v4026_v30  ;;  %1404 = vmatmul.mubr.bf16.gmra.mrb[8].mxu1 %v4026_v30 }
  0xde   : > { %v748_v5 = vpop.permute.xlu0 %747  ;;  %3295 = vrcp.f32 %v870_v63  ;;  %v856_v9 = vmul.f32 1.442695, %v827_v1  ;;  %v774_v11 = vmul.f32 %v3888_v19, %v753_v4  ;;  %1300 = vmatprep.mubr.bf16.mxu0 %v3574_v0  ;;  %1413 = vmatprep.mubr.bf16.mxu1 %v3574_v0  ;;  %v3234_v4 = vld [vmem:[%s4895_s9 + $0x28] sm:$0xff]  }
  0xdf   : > { %v854_v10 = vmul.f32 1.442695, %v826_v8  ;;  %v3286_v12 = vpop.eup %3285  ;;  %v773_v14 = vmul.f32 %v3888_v19, %v748_v5  ;;  %1473 = vmatpush1.bf16.msra.mxu0 %v3217_v2  ;;  %v3225_v19 = vld [vmem:[%s4891_s5 + $0x134] ss:$24 sps:$4 sm:$0xff]  }
  0xe0   : > { %v3288_v15 = vpop.eup %3287  ;;  %3297 = vpow2.f32 %v856_v9  ;;  %v790_v16 = vadd.f32 %v774_v11, %v673_v3  ;;  %v901_v17 = vmul.f32 %v3286_v12, %v3943_v28  ;;  %1474 = vmatprep.subr.bf16.mxu0 %v3222_v6  ;;  %v3235_v5 = vld [vmem:[%s4895_s9 + $0x30] sm:$0xff]  }
  0xe1   : > { %3299 = vpow2.f32 %v854_v10  ;;  %v789_v21 = vadd.f32 %v773_v14, %v672_v13  ;;  %v900_v20 = vmul.f32 %v3288_v15, %v3946_v29  ;;  %v3223_v29 = vld [vmem:[%s4891_s5 + $0x130] ss:$24 sps:$4 sm:$0xff]   ;;  %v1603_v6 = vpop.permute.xlu1 %1602 }
  0xe2   : > { %v3290_v22 = vpop.eup %3289  ;;  %v4053_v24 = vadd.f32 %v3901_v26, %v790_v16  ;;  %v1598_v13 = vpop.permute.xlu0 %1597 }
  0xe3   : > { %v3292_v25 = vpop.eup %3291  ;;  %v873_v28 = vadd.f32 1.0, %v3290_v22  ;;  %v4056_v27 = vadd.f32 %v3901_v26, %v789_v21  ;;  %v4058_v31 = vpack.c.bf16 %v901_v17, %v900_v20  ;;  %1475 = vmatpush1.bf16.msra.mxu0 %v3220_v18 }
  0xe4   : > { %v872_v32 = vadd.f32 1.0, %v3292_v25  ;;  %v829_v34 = vsub.f32 0.0, %v4053_v24  ;;  %1476 = vmatprep.subr.bf16.mxu0 %v3225_v19  ;;  %v968_v19 = vlaneseq }
  0xe5   : > { %3301 = vrcp.f32 %v873_v28  ;;  %v828_v35 = vsub.f32 0.0, %v4056_v27  ;;  %1301 = vmatmul.mubr.bf16.gmra.mrb[12].mxu0 %v4058_v31  ;;  %1414 = vmatmul.mubr.bf16.gmra.mrb[12].mxu1 %v4058_v31  ;;  %v1613_v9 = vpop.permute.xlu1 %1612  ;;  %v4148_v28 = vld [vmem:[%s4893_s7] ss:$0 sm:$0xff] }
  0xe6   : > { %3303 = vrcp.f32 %v872_v32  ;;  %v860_v26 = vmul.f32 1.442695, %v829_v34  ;;  %1310 = vmatprep.mubr.bf16.mxu0 %v3574_v0  ;;  %1423 = vmatprep.mubr.bf16.mxu1 %v3574_v0  ;;  %v1608_v15 = vpop.permute.xlu0 %1607  ;;  %v4143_v25 = vshrl.u32 %v968_v19, 7  ;;  %v4156_v34 = vld [vmem:[%s4892_s6] sm:$0x3f] }
  0xe7   : > { %v3294_v36 = vpop.eup %3293  ;;  %v858_v37 = vmul.f32 1.442695, %v828_v35  ;;  %1477 = vmatpush1.bf16.msra.mxu0 %v3223_v29  ;;  %v1679_v35 = vmul.f32 %v4148_v28, %v1598_v13 }
  0xe8   : > { %v3296_v39 = vpop.eup %3295  ;;  %3305 = vpow2.f32 %v860_v26  ;;  %v903_v40 = vmul.f32 %v3294_v36, %v3957_v56  ;;  %1478 = vmatprep.subr.bf16.mxu0 %v3228_v52  ;;  %v974_v29 = vsub.s32 1, %v4143_v25  ;;  %v4163_v52 = vld [vmem:[%s4894_s8] ss:$0 sm:$0xff]  ;;  %v4168_v26 = vld [vmem:[%s4893_s7 + $0x1] ss:$0 sm:$0xff]  ;;  %v1680_v36 = vmul.f32 %v4148_v28, %v1603_v6 }
  0xe9   : > { %3307 = vpow2.f32 %v858_v37  ;;  %v902_v42 = vmul.f32 %v3296_v39, %v3960_v57 }
  0xea   : > { %v3298_v43 = vpop.eup %3297  ;;  %v1724_v10 = vpop.permute.xlu1 %1723 }
  0xeb   : > { %v3300_v44 = vpop.eup %3299  ;;  %v875_v45 = vadd.f32 1.0, %v3298_v43  ;;  %v914_v46 = vpack.c.bf16 %v903_v40, %v902_v42  ;;  %1479 = vmatpush1.bf16.msra.mxu0 %v3226_v41  ;;  %v4131_v17 = vpop.permute.xlu0 %1622  ;;  %v4178_v41 = vrot.slane %v4156_v34, %v974_v29  ;;  %v1701_v42 = vadd.f32 %v4163_v52, %v1679_v35 }
  0xec   : > { %v874_v47 = vadd.f32 1.0, %v3300_v44  ;;  %v1787_v43 = vmul.f32 %v4168_v26, %v1724_v10 }
  0xed   : > { %3309 = vrcp.f32 %v875_v45  ;;  %1311 = vmatmul.mubr.bf16.gmra.mrb[16].mxu0 %v914_v46  ;;  %1424 = vmatmul.mubr.bf16.gmra.mrb[16].mxu1 %v914_v46 }
  0xee   : > { %3311 = vrcp.f32 %v874_v47  ;;  %1320 = vmatprep.mubr.bf16.mxu0 %v3574_v0  ;;  %1433 = vmatprep.mubr.bf16.mxu1 %v3574_v0  ;;  %v1728_v11 = vpop.permute.xlu1 %1727 }
  0xef   : > { %v3302_v56 = vpop.eup %3301  ;;  %v4137_v20 = vpop.permute.xlu0 %1642 }
  0xf0   : > { %v3304_v48 = vpop.eup %3303  ;;  %v905_v49 = vmul.f32 %v3302_v56, %v3988_v23 }
  0xf1   : > { %v904_v57 = vmul.f32 %v3304_v48, %v3992_v51 }
  0xf2   : > { %v3306_v50 = vpop.eup %3305 }
  0xf3   : > { %v3308_v53 = vpop.eup %3307  ;;  %v877_v54 = vadd.f32 1.0, %v3306_v50  ;;  %v915_v55 = vpack.c.bf16 %v905_v49, %v904_v57  ;;  %v4125_v12 = vpop.permute.xlu1 %1617 }
  0xf4   : > { %v876_v58 = vadd.f32 1.0, %v3308_v53  ;;  %v1683_v13 = vmul.f32 %v4148_v28, %v4125_v12  ;;  %v1684_v12 = vmul.f32 %v4148_v28, %v4131_v17 }
  0xf5   : > { %3313 = vrcp.f32 %v877_v54  ;;  %1321 = vmatmul.mubr.bf16.gmra.mrb[20].mxu0 %v915_v55  ;;  %1434 = vmatmul.mubr.bf16.gmra.mrb[20].mxu1 %v915_v55 }
  0xf6   : > { %3315 = vrcp.f32 %v876_v58  ;;  %1330 = vmatprep.mubr.bf16.mxu0 %v3574_v0  ;;  %1443 = vmatprep.mubr.bf16.mxu1 %v3574_v0  ;;  %v1706_v17 = vadd.f32 %v4163_v52, %v1684_v12 }
  0xf7   : > { %v3310_v59 = vpop.eup %3309  ;;  %v4127_v14 = vpop.permute.xlu1 %1627 }
  0xf8   : > { %v3312_v61 = vpop.eup %3311  ;;  %v907_v62 = vmul.f32 %v3310_v59, %v4021_v38  ;;  %v3231_v38 = vld [vmem:[%s4895_s9 + $0x10] sm:$0xff]  }
  0xf9   : > { %v906_v23 = vmul.f32 %v3312_v61, %v4024_v7  ;;  %v3232_v7 = vld [vmem:[%s4895_s9 + $0x18] sm:$0xff]  }
  0xfb   : > { %v916_v51 = vpack.c.bf16 %v907_v62, %v906_v23  ;;  %v4129_v16 = vpop.permute.xlu1 %1632  ;;  %v1681_v62 = vmul.f32 %v4148_v28, %v1608_v15 }
  0xfd   : > { %1331 = vmatmul.mubr.bf16.gmra.mrb[24].mxu0 %v916_v51  ;;  %1444 = vmatmul.mubr.bf16.gmra.mrb[24].mxu1 %v916_v51 }
  0xfe   : > { %1340 = vmatprep.mubr.bf16.mxu0 %v3574_v0  ;;  %1453 = vmatprep.mubr.bf16.mxu1 %v3574_v0 }
  0xff   : > { %v3314_v63 = vpop.eup %3313 }
 0x100   : > { %v3316_v1 = vpop.eup %3315  ;;  %v909_v8 = vmul.f32 %v3314_v63, %v4053_v24  ;;  %v4133_v18 = vpop.permute.xlu1 %1739 }
 0x101   : > { %v908_v2 = vmul.f32 %v3316_v1, %v4056_v27  ;;  %v4141_v24 = vpop.permute.xlu0 %1662 }
 0x103   : > { %v917_v3 = vpack.c.bf16 %v909_v8, %v908_v2  ;;  %v1682_v2 = vmul.f32 %v4148_v28, %v1613_v9 }
 0x104   : > { %v4135_v21 = vpop.permute.xlu1 %1743 }
 0x105   : > { %1341 = vmatmul.mubr.bf16.gmra.mrb[28].mxu0 %v917_v3  ;;  %1454 = vmatmul.mubr.bf16.gmra.mrb[28].mxu1 %v917_v3  ;;  %v1720_v32 = vpop.permute.xlu0 %1719  ;;  %v1704_v9 = vadd.f32 %v4163_v52, %v1682_v2 }
 0x106   : > { %1496 = vmatprep.mubr.bf16.mxu0 %v3574_v0  ;;  %v1786_v37 = vmul.f32 %v4168_v26, %v1720_v32 }
 0x108   : > { %v1802_v47 = vadd.f32 %v1786_v37, %v1701_v42 }
 0x109   : > { %v4139_v22 = vpop.permute.xlu1 %1637  ;;  %v1732_v23 = vpop.permute.xlu0 %1731 }
 0x10d   : > { %1497 = vmatmul.mubr.bf16.vlgmr.msra.gmra.mrb[32].mxu0 %v3962_v60  ;;  %v3229_v60 = vld [vmem:[%s4895_s9] sm:$0xff]   ;;  %v4150_v27 = vpop.permute.xlu1 %1647 }
 0x10e   : > { %1506 = vmatprep.mubr.bf16.mxu0 %v3574_v0  ;;  %2992 = vmatprep.subr.bf16.mxu1 %v3229_v60 }
 0x10f   : > { %2993 = vmatpush3.bf16.msra.mxu1 %v3229_v60 }
 0x111   : > { %v4175_v40 = vpop.permute.xlu1 %1652 }
 0x115   : > { %1507 = vmatmul.mubr.bf16.gmra.mrb[36].mxu0 %v3995_v33  ;;  %v3230_v33 = vld [vmem:[%s4895_s9 + $0x8] sm:$0xff]  }
 0x116   : > { %1516 = vmatprep.mubr.bf16.mxu0 %v3574_v0  ;;  %2994 = vmatprep.subr.bf16.mxu1 %v3230_v33 }
 0x117   : > { %2995 = vmatpush3.bf16.msra.mxu1 %v3230_v33 }
 0x118   : > { %2996 = vmatprep.subr.bf16.mxu1 %v3231_v38 }
 0x11b   : > { %2997 = vmatpush3.bf16.msra.mxu1 %v3231_v38  ;;  %v1703_v38 = vadd.f32 %v4163_v52, %v1681_v62 }
 0x11c   : > { %2998 = vmatprep.subr.bf16.mxu1 %v3232_v7 }
 0x11d   : > { %1517 = vmatmul.mubr.bf16.gmra.mrb[40].mxu0 %v4026_v30  ;;  %v3233_v30 = vld [vmem:[%s4895_s9 + $0x20] sm:$0xff]  }
 0x11e   : > { %1526 = vmatprep.mubr.bf16.mxu0 %v3574_v0 }
 0x11f   : > { %2999 = vmatpush3.bf16.msra.mxu1 %v3232_v7  ;;  %v1789_v7 = vmul.f32 %v4168_v26, %v1732_v23  ;;  %v1685_v23 = vmul.f32 %v4148_v28, %v4127_v14 }
 0x120   : > { %3000 = vmatprep.subr.bf16.mxu1 %v3233_v30 }
 0x121   : > { %v1805_v37 = vadd.f32 %v1789_v7, %v1704_v9 }
 0x123   : > { %3001 = vmatpush3.bf16.msra.mxu1 %v3233_v30 }
 0x124   : > { %3002 = vmatprep.subr.bf16.mxu1 %v3234_v4 }
 0x125   : > { %1527 = vmatmul.mubr.bf16.gmra.mrb[44].mxu0 %v4058_v31  ;;  %v970_v31 = vsub.s32 0, %v4143_v25 }
 0x126   : > { %1536 = vmatprep.mubr.bf16.mxu0 %v3574_v0 }
 0x127   : > { %3003 = vmatpush3.bf16.msra.mxu1 %v3234_v4  ;;  %v4173_v39 = vrot.slane %v4156_v34, %v970_v31  ;;  %v1736_v4 = vpop.permute.xlu0 %1735 }
 0x128   : > { %3004 = vmatprep.subr.bf16.mxu1 %v3235_v5 }
 0x12b   : > { %3005 = vmatpush3.bf16.msra.mxu1 %v3235_v5 }
 0x12d   : > { %1537 = vmatmul.mubr.bf16.gmra.mrb[48].mxu0 %v914_v46  ;;  %v1702_v46 = vadd.f32 %v4163_v52, %v1680_v36 }
 0x12e   : > { %1546 = vmatprep.mubr.bf16.mxu0 %v3574_v0 }
 0x12f   : > { %v1803_v54 = vadd.f32 %v1787_v43, %v1702_v46 }
 0x135   : > { %1547 = vmatmul.mubr.bf16.gmra.mrb[52].mxu0 %v915_v55 }
 0x136   : > { %1556 = vmatprep.mubr.bf16.mxu0 %v3574_v0 }
 0x13d   : > { %1557 = vmatmul.mubr.bf16.gmra.mrb[56].mxu0 %v916_v51  ;;  %v4195_v51 = vpop.permute.xlu1 %1755 }
 0x13e   : > { %1566 = vmatprep.mubr.bf16.mxu0 %v3574_v0  ;;  %v3236_v0 = vld [vmem:[%s4895_s9 + $0x38] sm:$0xff]  }
 0x13f   : > { %3006 = vmatprep.subr.bf16.mxu1 %v3236_v0 }
 0x140   : > { %3007 = vmatpush3.bf16.msra.mxu1 %v3236_v0 }
 0x141   : > { %v4207_v30 = vpop.permute.xlu1 %1759 }
 0x145   : > { %1567 = vmatmul.mubr.bf16.gmra.mrb[60].mxu0 %v917_v3  ;;  %v1788_v3 = vmul.f32 %v4168_v26, %v1728_v11 }
 0x147   : > { %v1804_v11 = vadd.f32 %v1788_v3, %v1703_v38 }
 0x1a0   : > { %v1272_v44 = vpop.f32.mrb[0].mxu0  ;;  %v4182_v45 = vpop.f32.mrb[0].mxu1 }
 0x1a1   : > { %v1273_v56 = vadd.f32 %v1272_v44, %v4173_v39  ;;  %v1274_v48 = vpop.f32.mrb[1].mxu0  ;;  %v4186_v49 = vpop.f32.mrb[1].mxu1 }
 0x1a2   : > { %v1275_v57 = vadd.f32 %v1274_v48, %v4178_v41  ;;  %v1276_v50 = vpop.f32.mrb[2].mxu0  ;;  %v4189_v53 = vpop.f32.mrb[2].mxu1  ;;  %v1790_v48 = vmul.f32 %v4168_v26, %v1736_v4  ;;  %v1686_v4 = vmul.f32 %v4148_v28, %v4129_v16  ;;  %v1792_v16 = vmul.f32 %v4168_v26, %v4135_v21 }
 0x1a3   : > { %v1818_v55 = vmul.f32 %v1802_v47, %v1273_v56  ;;  %v1277_v58 = vadd.f32 %v1276_v50, %v4173_v39  ;;  %v1278_v59 = vpop.f32.mrb[3].mxu0  ;;  %v4192_v61 = vpop.f32.mrb[3].mxu1  ;;  %v1705_v56 = vadd.f32 %v4163_v52, %v1683_v13 }
 0x1a4   : > { %v1279_v63 = vadd.f32 %v1278_v59, %v4178_v41  ;;  %v1708_v12 = vadd.f32 %v4163_v52, %v1686_v4 }
 0x1a5   : > { %v4198_v1 = vadd.f32 %v1818_v55, %v1275_v57  ;;  %v1819_v8 = vmul.f32 %v1803_v54, %v1277_v58  ;;  %v1791_v54 = vmul.f32 %v4168_v26, %v4133_v18  ;;  %v4233_v55 = vpop.permute.xlu1 %1657  ;;  %v1748_v58 = vpop.permute.xlu0 %1747  ;;  %v1806_v2 = vadd.f32 %v1790_v48, %v1705_v56 }
 0x1a7   : > { %v1850_v60 = vsub.f32 0.0, %v4198_v1  ;;  %v4203_v33 = vadd.f32 %v1819_v8, %v1279_v63 }
 0x1a8   : > { %v1282_v6 = vpop.f32.mrb[4].mxu0  ;;  %v4210_v10 = vpop.f32.mrb[4].mxu1 }
 0x1a9   : > { %v1866_v5 = vmul.f32 1.442695, %v1850_v60  ;;  %v1851_v0 = vsub.f32 0.0, %v4203_v33  ;;  %v1283_v15 = vadd.f32 %v1282_v6, %v4173_v39  ;;  %v1284_v19 = vpop.f32.mrb[5].mxu0  ;;  %v4216_v31 = vpop.f32.mrb[5].mxu1 }
 0x1aa   : > { %v1285_v29 = vadd.f32 %v1284_v19, %v4178_v41  ;;  %v1286_v35 = vpop.f32.mrb[6].mxu0  ;;  %v4219_v36 = vpop.f32.mrb[6].mxu1 }
 0x1ab   : > { %3317 = vpow2.f32 %v1866_v5  ;;  %v1868_v32 = vmul.f32 1.442695, %v1851_v0  ;;  %v1820_v42 = vmul.f32 %v1804_v11, %v1283_v15  ;;  %v1287_v43 = vadd.f32 %v1286_v35, %v4173_v39  ;;  %v1288_v44 = vpop.f32.mrb[7].mxu0  ;;  %v4222_v46 = vpop.f32.mrb[7].mxu1 }
 0x1ac   : > { %v1289_v47 = vadd.f32 %v1288_v44, %v4178_v41  ;;  %v1807_v5 = vadd.f32 %v1791_v54, %v1706_v17  ;;  %v4263_v56 = vpop.permute.xlu1 %1667  ;;  %v1687_v17 = vmul.f32 %v4148_v28, %v4139_v22 }
 0x1ad   : > { %3319 = vpow2.f32 %v1868_v32  ;;  %v4229_v57 = vadd.f32 %v1820_v42, %v1285_v29  ;;  %v1821_v50 = vmul.f32 %v1805_v37, %v1287_v43  ;;  %v1707_v29 = vadd.f32 %v4163_v52, %v1685_v23 }
 0x1af   : > { %v1852_v59 = vsub.f32 0.0, %v4229_v57  ;;  %v4236_v62 = vadd.f32 %v1821_v50, %v1289_v47  ;;  %v1793_v47 = vmul.f32 %v4168_v26, %v1748_v58  ;;  %v1752_v50 = vpop.permute.xlu0 %1751 }
 0x1b0   : > { %v1292_v63 = vpop.f32.mrb[8].mxu0  ;;  %v4241_v8 = vpop.f32.mrb[8].mxu1 }
 0x1b1   : > { %v1870_v3 = vmul.f32 1.442695, %v1852_v59  ;;  %v1853_v60 = vsub.f32 0.0, %v4236_v62  ;;  %v1293_v18 = vadd.f32 %v1292_v63, %v4173_v39  ;;  %v1294_v38 = vpop.f32.mrb[9].mxu0  ;;  %v4245_v7 = vpop.f32.mrb[9].mxu1  ;;  %v1808_v59 = vadd.f32 %v1792_v16, %v1707_v29 }
 0x1b2   : > { %v1295_v0 = vadd.f32 %v1294_v38, %v4178_v41  ;;  %v1296_v6 = vpop.f32.mrb[10].mxu0  ;;  %v4250_v14 = vpop.f32.mrb[10].mxu1  ;;  %v1809_v38 = vadd.f32 %v1793_v47, %v1708_v12  ;;  %v1795_v12 = vmul.f32 %v4168_v26, %v4195_v51 }
 0x1b3   : > { %3321 = vpow2.f32 %v1870_v3  ;;  %v1872_v9 = vmul.f32 1.442695, %v1853_v60  ;;  %v1822_v11 = vmul.f32 %v1806_v2, %v1293_v18  ;;  %v1297_v13 = vadd.f32 %v1296_v6, %v4173_v39  ;;  %v1298_v15 = vpop.f32.mrb[11].mxu0  ;;  %v4253_v19 = vpop.f32.mrb[11].mxu1 }
 0x1b4   : > { %v1299_v35 = vadd.f32 %v1298_v15, %v4178_v41  ;;  %v1688_v15 = vmul.f32 %v4148_v28, %v4137_v20  ;;  %v4293_v20 = vpop.permute.xlu1 %1672 }
 0x1b5   : > { %v3318_v32 = vpop.eup %3317  ;;  %3323 = vpow2.f32 %v1872_v9  ;;  %v4259_v42 = vadd.f32 %v1822_v11, %v1295_v0  ;;  %v1823_v43 = vmul.f32 %v1807_v5, %v1297_v13 }
 0x1b6   : > { %v1898_v37 = vadd.f32 1.0, %v3318_v32  ;;  %v1709_v32 = vadd.f32 %v4163_v52, %v1687_v17 }
 0x1b7   : > { %v3320_v44 = vpop.eup %3319  ;;  %v1854_v54 = vsub.f32 0.0, %v4259_v42  ;;  %v4266_v21 = vadd.f32 %v1823_v43, %v1299_v35  ;;  %v1794_v35 = vmul.f32 %v4168_v26, %v1752_v50  ;;  %v1710_v50 = vadd.f32 %v4163_v52, %v1688_v15 }
 0x1b8   : > { %3325 = vrcp.f32 %v1898_v37  ;;  %v1899_v48 = vadd.f32 1.0, %v3320_v44  ;;  %v1302_v23 = vpop.f32.mrb[12].mxu0  ;;  %v4270_v63 = vpop.f32.mrb[12].mxu1  ;;  %v1689_v44 = vmul.f32 %v4148_v28, %v4150_v27 }
 0x1b9   : > { %v1874_v2 = vmul.f32 1.442695, %v1854_v54  ;;  %v1855_v58 = vsub.f32 0.0, %v4266_v21  ;;  %v1303_v3 = vadd.f32 %v1302_v23, %v4173_v39  ;;  %v1304_v60 = vpop.f32.mrb[13].mxu0  ;;  %v4274_v18 = vpop.f32.mrb[13].mxu1 }
 0x1ba   : > { %3327 = vrcp.f32 %v1899_v48  ;;  %v1305_v4 = vadd.f32 %v1304_v60, %v4178_v41  ;;  %v1306_v5 = vpop.f32.mrb[14].mxu0  ;;  %v4277_v0 = vpop.f32.mrb[14].mxu1 }
 0x1bb   : > { %3329 = vpow2.f32 %v1874_v2  ;;  %v1876_v22 = vmul.f32 1.442695, %v1855_v58  ;;  %v1824_v6 = vmul.f32 %v1808_v59, %v1303_v3  ;;  %v1307_v9 = vadd.f32 %v1306_v5, %v4173_v39  ;;  %v1308_v11 = vpop.f32.mrb[15].mxu0  ;;  %v4280_v13 = vpop.f32.mrb[15].mxu1 }
 0x1bc   : > { %v1309_v29 = vadd.f32 %v1308_v11, %v4178_v41  ;;  %v1764_v54 = vpop.permute.xlu0 %1763  ;;  %v1810_v3 = vadd.f32 %v1794_v35, %v1709_v32 }
 0x1bd   : > { %v3322_v16 = vpop.eup %3321  ;;  %3331 = vpow2.f32 %v1876_v22  ;;  %v4287_v37 = vadd.f32 %v1824_v6, %v1305_v4  ;;  %v1825_v43 = vmul.f32 %v1809_v38, %v1307_v9  ;;  %v1711_v22 = vadd.f32 %v4163_v52, %v1689_v44 }
 0x1be   : > { %v1900_v47 = vadd.f32 1.0, %v3322_v16  ;;  %v1811_v6 = vadd.f32 %v1795_v12, %v1710_v50 }
 0x1bf   : > { %v3324_v48 = vpop.eup %3323  ;;  %v1856_v59 = vsub.f32 0.0, %v4287_v37  ;;  %v4296_v17 = vadd.f32 %v1825_v43, %v1309_v29 }
 0x1c0   : > { %3333 = vrcp.f32 %v1900_v47  ;;  %v1901_v23 = vadd.f32 1.0, %v3324_v48  ;;  %v1312_v2 = vpop.f32.mrb[16].mxu0  ;;  %v4299_v58 = vpop.f32.mrb[16].mxu1  ;;  %v1690_v48 = vmul.f32 %v4148_v28, %v4175_v40  ;;  %v1691_v40 = vmul.f32 %v4148_v28, %v4233_v55 }
 0x1c1   : > { %v1878_v60 = vmul.f32 1.442695, %v1856_v59  ;;  %v1857_v51 = vsub.f32 0.0, %v4296_v17  ;;  %v1313_v38 = vadd.f32 %v1312_v2, %v4173_v39  ;;  %v1314_v4 = vpop.f32.mrb[17].mxu0  ;;  %v4303_v5 = vpop.f32.mrb[17].mxu1 }
 0x1c2   : > { %v3326_v27 = vpop.eup %3325  ;;  %3335 = vrcp.f32 %v1901_v23  ;;  %v1315_v9 = vadd.f32 %v1314_v4, %v4178_v41  ;;  %v1316_v11 = vpop.f32.mrb[18].mxu0  ;;  %v1796_v23 = vmul.f32 %v4168_v26, %v4207_v30 }
 0x1c3   : > { %v4307_v15 = vpop.f32.mrb[18].mxu1  ;;  %3337 = vpow2.f32 %v1878_v60  ;;  %v1880_v32 = vmul.f32 1.442695, %v1857_v51  ;;  %v1826_v16 = vmul.f32 %v1810_v3, %v1313_v38  ;;  %v1317_v35 = vadd.f32 %v1316_v11, %v4173_v39  ;;  %v1318_v43 = vpop.f32.mrb[19].mxu0 }
 0x1c4   : > { %v3328_v29 = vpop.eup %3327  ;;  %v4310_v47 = vpop.f32.mrb[19].mxu1  ;;  %v1930_v44 = vmul.f32 %v3326_v27, %v4198_v1  ;;  %v1319_v59 = vadd.f32 %v1318_v43, %v4178_v41  ;;  %v1712_v11 = vadd.f32 %v4163_v52, %v1690_v48  ;;  %v1692_v48 = vmul.f32 %v4148_v28, %v4141_v24 }
 0x1c5   : > { %v1931_v12 = vmul.f32 %v3328_v29, %v4203_v33  ;;  %v3330_v50 = vpop.eup %3329  ;;  %3339 = vpow2.f32 %v1880_v32  ;;  %v4319_v2 = vadd.f32 %v1826_v16, %v1315_v9  ;;  %v1827_v3 = vmul.f32 %v1811_v6, %v1317_v35  ;;  %v1772_v4 = vpop.permute.xlu1 %1771 }
 0x1c6   : > { %v1902_v60 = vadd.f32 1.0, %v3330_v50  ;;  %v1768_v1 = vpop.permute.xlu0 %1767  ;;  %v1797_v9 = vmul.f32 %v4168_v26, %v1764_v54  ;;  %v1812_v32 = vadd.f32 %v1796_v23, %v1711_v22  ;;  %v1713_v22 = vadd.f32 %v4163_v52, %v1691_v40 }
 0x1c7   : > { %v1946_v51 = vpack.c.bf16 %v1931_v12, %v1930_v44  ;;  %v3332_v38 = vpop.eup %3331  ;;  %v1858_v33 = vsub.f32 0.0, %v4319_v2  ;;  %v4324_v27 = vadd.f32 %v1827_v3, %v1319_v59 }
 0x1c8   : > { %3341 = vrcp.f32 %v1902_v60  ;;  %v1903_v30 = vadd.f32 1.0, %v3332_v38  ;;  %v1322_v29 = vpop.f32.mrb[20].mxu0  ;;  %v4328_v6 = vpop.f32.mrb[20].mxu1 }
 0x1c9   : > { %3008 = vmatprep.mubr.bf16.mxu1 %v1946_v51  ;;  %v1882_v16 = vmul.f32 1.442695, %v1858_v33  ;;  %v1859_v55 = vsub.f32 0.0, %v4324_v27  ;;  %v1323_v35 = vadd.f32 %v1322_v29, %v4173_v39  ;;  %v1324_v43 = vpop.f32.mrb[21].mxu0  ;;  %v4332_v44 = vpop.f32.mrb[21].mxu1  ;;  %v1813_v33 = vadd.f32 %v1797_v9, %v1712_v11 }
 0x1ca   : > { %4918 = vst [vmem:[#allocation10_spill] sm:$0xff] %v4332_v44  ;;  %v3334_v12 = vpop.eup %3333  ;;  %3343 = vrcp.f32 %v1903_v30  ;;  %v1325_v54 = vadd.f32 %v1324_v43, %v4178_v41  ;;  %v1326_v59 = vpop.f32.mrb[22].mxu0  ;;  %v1798_v29 = vmul.f32 %v4168_v26, %v1768_v1  ;;  %v1799_v1 = vmul.f32 %v4168_v26, %v1772_v4 }
 0x1cb   : > { %v4337_v50 = vpop.f32.mrb[22].mxu1  ;;  %3345 = vpow2.f32 %v1882_v16  ;;  %v1884_v23 = vmul.f32 1.442695, %v1859_v55  ;;  %v1828_v3 = vmul.f32 %v1812_v32, %v1323_v35  ;;  %v1328_v60 = vpop.f32.mrb[23].mxu0  ;;  %v1327_v24 = vadd.f32 %v1326_v59, %v4173_v39 }
 0x1cc   : > { %4919 = vst [vmem:[#allocation11_spill] sm:$0xff] %v4337_v50  ;;  %v4340_v51 = vpop.f32.mrb[23].mxu1  ;;  %v3336_v38 = vpop.eup %3335  ;;  %v1329_v30 = vadd.f32 %v1328_v60, %v4178_v41  ;;  %v1932_v44 = vmul.f32 %v3334_v12, %v4229_v57  ;;  %v1693_v32 = vmul.f32 %v4148_v28, %v4263_v56 }
 0x1cd   : > { %v3338_v43 = vpop.eup %3337  ;;  %v1933_v50 = vmul.f32 %v3336_v38, %v4236_v62  ;;  %3347 = vpow2.f32 %v1884_v23  ;;  %v4347_v40 = vadd.f32 %v1828_v3, %v1325_v54  ;;  %v1829_v55 = vmul.f32 %v1813_v33, %v1327_v24  ;;  %v1776_v59 = vpop.permute.xlu1 %1775 }
 0x1ce   : > { %v1904_v16 = vadd.f32 1.0, %v3338_v43  ;;  %v1714_v54 = vadd.f32 %v4163_v52, %v1692_v48  ;;  %v1814_v23 = vadd.f32 %v1798_v29, %v1713_v22 }
 0x1cf   : > { %v3340_v11 = vpop.eup %3339  ;;  %v1947_v9 = vpack.c.bf16 %v1933_v50, %v1932_v44  ;;  %v1860_v35 = vsub.f32 0.0, %v4347_v40  ;;  %v4353_v57 = vadd.f32 %v1829_v55, %v1329_v30  ;;  %v1715_v44 = vadd.f32 %v4163_v52, %v1693_v32 }
 0x1d0   : > { %3349 = vrcp.f32 %v1904_v16  ;;  %v1905_v60 = vadd.f32 1.0, %v3340_v11  ;;  %v1332_v62 = vpop.f32.mrb[24].mxu0  ;;  %v4355_v12 = vpop.f32.mrb[24].mxu1  ;;  %v1815_v48 = vadd.f32 %v1799_v1, %v1714_v54  ;;  %v1694_v32 = vmul.f32 %v4148_v28, %v4293_v20 }
 0x1d1   : > { %v1886_v56 = vmul.f32 1.442695, %v1860_v35  ;;  %v1333_v3 = vadd.f32 %v1332_v62, %v4173_v39  ;;  %v1334_v38 = vpop.f32.mrb[25].mxu0  ;;  %v4359_v33 = vpop.f32.mrb[25].mxu1  ;;  %3009 = vmatmul.mubr.bf16.vlgmr.msra.gmra.mrb[32].mxu1 %v1947_v9  ;;  %v1861_v50 = vsub.f32 0.0, %v4353_v57  ;;  %v1800_v9 = vmul.f32 %v4168_v26, %v1776_v59 }
 0x1d2   : > { %v3342_v4 = vpop.eup %3341  ;;  %3351 = vrcp.f32 %v1905_v60  ;;  %v1335_v24 = vadd.f32 %v1334_v38, %v4178_v41  ;;  %v1336_v30 = vpop.f32.mrb[26].mxu0  ;;  %v1716_v59 = vadd.f32 %v4163_v52, %v1694_v32 }
 0x1d3   : > { %v4364_v43 = vpop.f32.mrb[26].mxu1  ;;  %3353 = vpow2.f32 %v1886_v56  ;;  %v1830_v22 = vmul.f32 %v1814_v23, %v1333_v3  ;;  %v1337_v29 = vadd.f32 %v1336_v30, %v4173_v39  ;;  %v1338_v16 = vpop.f32.mrb[27].mxu0  ;;  %v1888_v35 = vmul.f32 1.442695, %v1861_v50 }
 0x1d4   : > { %v4367_v55 = vpop.f32.mrb[27].mxu1  ;;  %v3344_v11 = vpop.eup %3343  ;;  %v1339_v60 = vadd.f32 %v1338_v16, %v4178_v41  ;;  %v1934_v38 = vmul.f32 %v3342_v4, %v4259_v42 }
 0x1d5   : > { %4920 = vst [vmem:[#allocation12_spill] sm:$0xff] %v4367_v55  ;;  %v3346_v62 = vpop.eup %3345  ;;  %v1935_v1 = vmul.f32 %v3344_v11, %v4266_v21  ;;  %v1780_v54 = vpop.permute.xlu0 %1779  ;;  %v4375_v23 = vadd.f32 %v1830_v22, %v1335_v24  ;;  %v1831_v56 = vmul.f32 %v1815_v48, %v1337_v29  ;;  %3355 = vpow2.f32 %v1888_v35 }
 0x1d6   : > { %v1906_v3 = vadd.f32 1.0, %v3346_v62  ;;  %v1801_v50 = vmul.f32 %v4168_v26, %v1780_v54  ;;  %v1816_v24 = vadd.f32 %v1800_v9, %v1715_v44 }
 0x1d7   : > { %v3348_v30 = vpop.eup %3347  ;;  %v1862_v55 = vsub.f32 0.0, %v4375_v23  ;;  %v4378_v28 = vadd.f32 %v1831_v56, %v1339_v60  ;;  %v1948_v20 = vpack.c.bf16 %v1935_v1, %v1934_v38 }
 0x1d8   : > { %3357 = vrcp.f32 %v1906_v3  ;;  %v1907_v42 = vadd.f32 1.0, %v3348_v30  ;;  %v1342_v4 = vpop.f32.mrb[28].mxu0  ;;  %v4382_v21 = vpop.f32.mrb[28].mxu1  ;;  %v1817_v38 = vadd.f32 %v1801_v50, %v1716_v59 }
 0x1d9   : > { %v1890_v22 = vmul.f32 1.442695, %v1862_v55  ;;  %v1863_v48 = vsub.f32 0.0, %v4378_v28  ;;  %v1343_v29 = vadd.f32 %v1342_v4, %v4173_v39  ;;  %v1344_v16 = vpop.f32.mrb[29].mxu0  ;;  %v4386_v11 = vpop.f32.mrb[29].mxu1  ;;  %3012 = vmatprep.mubr.bf16.mxu1 %v1948_v20 }
 0x1da   : > { %v3350_v35 = vpop.eup %3349  ;;  %3359 = vrcp.f32 %v1907_v42  ;;  %v1345_v52 = vadd.f32 %v1344_v16, %v4178_v41  ;;  %v1346_v26 = vpop.f32.mrb[30].mxu0 }
 0x1db   : > { %v4389_v32 = vpop.f32.mrb[30].mxu1  ;;  %3361 = vpow2.f32 %v1890_v22  ;;  %v1892_v60 = vmul.f32 1.442695, %v1863_v48  ;;  %v1832_v62 = vmul.f32 %v1816_v24, %v1343_v29  ;;  %v1348_v44 = vpop.f32.mrb[31].mxu0  ;;  %v1347_v1 = vadd.f32 %v1346_v26, %v4173_v39 }
 0x1dc   : > { %v4391_v55 = vpop.f32.mrb[31].mxu1  ;;  %v3352_v9 = vpop.eup %3351  ;;  %v1349_v54 = vadd.f32 %v1348_v44, %v4178_v41  ;;  %v1936_v3 = vmul.f32 %v3350_v35, %v4287_v37 }
 0x1dd   : > { %v3354_v56 = vpop.eup %3353  ;;  %v1937_v30 = vmul.f32 %v3352_v9, %v4296_v17  ;;  %3363 = vpow2.f32 %v1892_v60  ;;  %v4397_v20 = vadd.f32 %v1832_v62, %v1345_v52  ;;  %v1833_v4 = vmul.f32 %v1817_v38, %v1347_v1 }
 0x1de   : > { %v1908_v42 = vadd.f32 1.0, %v3354_v56 }
 0x1df   : > { %v1864_v24 = vsub.f32 0.0, %v4397_v20  ;;  %v1949_v22 = vpack.c.bf16 %v1937_v30, %v1936_v3  ;;  %v3356_v48 = vpop.eup %3355  ;;  %v1849_v29 = vadd.f32 %v1833_v4, %v1349_v54 }
 0x1e0   : > { %v4400_v59 = vpop.f32.mrb[32].mxu0  ;;  %3365 = vrcp.f32 %v1908_v42  ;;  %v1909_v39 = vadd.f32 1.0, %v3356_v48 }
 0x1e1   : > { %v1894_v41 = vmul.f32 1.442695, %v1864_v24  ;;  %v4402_v50 = vpop.f32.mrb[33].mxu0  ;;  %3013 = vmatmul.mubr.bf16.gmra.mrb[36].mxu1 %v1949_v22  ;;  %v1865_v17 = vsub.f32 0.0, %v1849_v29 }
 0x1e2   : > { %v3358_v37 = vpop.eup %3357  ;;  %v4404_v16 = vpop.f32.mrb[34].mxu0  ;;  %3367 = vrcp.f32 %v1909_v39 }
 0x1e3   : > { %v4406_v35 = vpop.f32.mrb[35].mxu0  ;;  %3369 = vpow2.f32 %v1894_v41  ;;  %v1896_v26 = vmul.f32 1.442695, %v1865_v17  ;;  %v1938_v62 = vmul.f32 %v3358_v37, %v4319_v2 }
 0x1e4   : > { %v3360_v52 = vpop.eup %3359 }
 0x1e5   : > { %v3362_v60 = vpop.eup %3361  ;;  %v1939_v44 = vmul.f32 %v3360_v52, %v4324_v27  ;;  %3371 = vpow2.f32 %v1896_v26 }
 0x1e6   : > { %v1910_v9 = vadd.f32 1.0, %v3362_v60 }
 0x1e7   : > { %v3364_v38 = vpop.eup %3363  ;;  %v1950_v1 = vpack.c.bf16 %v1939_v44, %v1938_v62 }
 0x1e8   : > { %3373 = vrcp.f32 %v1910_v9  ;;  %v1911_v54 = vadd.f32 1.0, %v3364_v38  ;;  %v4410_v56 = vpop.f32.mrb[36].mxu0 }
 0x1e9   : > { %v4412_v3 = vpop.f32.mrb[37].mxu0  ;;  %3016 = vmatprep.mubr.bf16.mxu1 %v1950_v1 }
 0x1ea   : > { %3375 = vrcp.f32 %v1911_v54  ;;  %v4414_v30 = vpop.f32.mrb[38].mxu0  ;;  %v3366_v42 = vpop.eup %3365 }
 0x1eb   : > { %v4416_v4 = vpop.f32.mrb[39].mxu0  ;;  %v1940_v27 = vmul.f32 %v3366_v42, %v4347_v40 }
 0x1ec   : > { %v3368_v2 = vpop.eup %3367 }
 0x1ed   : > { %v3370_v24 = vpop.eup %3369  ;;  %v1941_v22 = vmul.f32 %v3368_v2, %v4353_v57 }
 0x1ee   : > { %v1912_v48 = vadd.f32 1.0, %v3370_v24 }
 0x1ef   : > { %v3372_v39 = vpop.eup %3371  ;;  %v1951_v37 = vpack.c.bf16 %v1941_v22, %v1940_v27 }
 0x1f0   : > { %v4420_v41 = vpop.f32.mrb[40].mxu0  ;;  %3377 = vrcp.f32 %v1912_v48  ;;  %v1913_v17 = vadd.f32 1.0, %v3372_v39 }
 0x1f1   : > { %v4422_v52 = vpop.f32.mrb[41].mxu0  ;;  %3017 = vmatmul.mubr.bf16.gmra.mrb[40].mxu1 %v1951_v37 }
 0x1f2   : > { %v3374_v26 = vpop.eup %3373  ;;  %v4424_v60 = vpop.f32.mrb[42].mxu0  ;;  %3379 = vrcp.f32 %v1913_v17 }
 0x1f3   : > { %v4426_v62 = vpop.f32.mrb[43].mxu0  ;;  %v1942_v40 = vmul.f32 %v3374_v26, %v4375_v23 }
 0x1f4   : > { %v3376_v44 = vpop.eup %3375 }
 0x1f5   : > { %v1943_v57 = vmul.f32 %v3376_v44, %v4378_v28 }
 0x1f7   : > { %v1952_v9 = vpack.c.bf16 %v1943_v57, %v1942_v40 }
 0x1f8   : > { %v4430_v38 = vpop.f32.mrb[44].mxu0 }
 0x1f9   : > { %v4432_v1 = vpop.f32.mrb[45].mxu0  ;;  %3020 = vmatprep.mubr.bf16.mxu1 %v1952_v9 }
 0x1fa   : > { %v4434_v54 = vpop.f32.mrb[46].mxu0  ;;  %v3378_v42 = vpop.eup %3377 }
 0x1fb   : > { %v4436_v2 = vpop.f32.mrb[47].mxu0  ;;  %v1944_v27 = vmul.f32 %v3378_v42, %v4397_v20 }
 0x1fc   : > { %v3380_v24 = vpop.eup %3379 }
 0x1fd   : > { %v1945_v22 = vmul.f32 %v3380_v24, %v1849_v29 }
 0x1ff   : > { %v1953_v23 = vpack.c.bf16 %v1945_v22, %v1944_v27 }
 0x200   : > { %v4439_v48 = vpop.f32.mrb[48].mxu0 }
 0x201   : > { %4921 = vst [vmem:[#allocation13_spill] sm:$0xff] %v4439_v48  ;;  %v4441_v39 = vpop.f32.mrb[49].mxu0  ;;  %3021 = vmatmul.mubr.bf16.gmra.mrb[44].mxu1 %v1953_v23  ;;  %v3237_v23 = vld [vmem:[%s4897_s11] sm:$0xff]  }
 0x202   : > { %4922 = vst [vmem:[#allocation14_spill] sm:$0xff] %v4441_v39  ;;  %v4443_v28 = vpop.f32.mrb[50].mxu0  ;;  %3024 = vmatprep.subr.bf16.mxu1 %v3237_v23 }
 0x203   : > { %4923 = vst [vmem:[#allocation15_spill] sm:$0xff] %v4443_v28  ;;  %v4445_v37 = vpop.f32.mrb[51].mxu0  ;;  %3025 = vmatpush3.bf16.msra.mxu1 %v3237_v23  ;;  %v3241_v23 = vld [vmem:[%s4897_s11 + $0x20] sm:$0xff]  }
 0x204   : > { %4924 = vst [vmem:[#allocation16_spill] sm:$0xff] %v4445_v37 }
 0x208   : > { %v4447_v17 = vpop.f32.mrb[52].mxu0 }
 0x209   : > { %4925 = vst [vmem:[#allocation17_spill] sm:$0xff] %v4447_v17  ;;  %v4449_v26 = vpop.f32.mrb[53].mxu0 }
 0x20a   : > { %4926 = vst [vmem:[#allocation18_spill] sm:$0xff] %v4449_v26  ;;  %v4451_v44 = vpop.f32.mrb[54].mxu0 }
 0x20b   : > { %4927 = vst [vmem:[#allocation19_spill] sm:$0xff] %v4451_v44  ;;  %v4453_v40 = vpop.f32.mrb[55].mxu0 }
 0x20c   : > { %4928 = vst [vmem:[#allocation20_spill] sm:$0xff] %v4453_v40 }
 0x210   : > { %v4455_v20 = vpop.f32.mrb[56].mxu0 }
 0x211   : > { %4929 = vst [vmem:[#allocation21_spill] sm:$0xff] %v4455_v20  ;;  %v4457_v29 = vpop.f32.mrb[57].mxu0 }
 0x212   : > { %4930 = vst [vmem:[#allocation22_spill] sm:$0xff] %v4457_v29  ;;  %v4459_v57 = vpop.f32.mrb[58].mxu0 }
 0x213   : > { %4931 = vst [vmem:[#allocation23_spill] sm:$0xff] %v4459_v57  ;;  %v4461_v9 = vpop.f32.mrb[59].mxu0  ;;  %v3238_v57 = vld [vmem:[%s4897_s11 + $0x8] sm:$0xff]  }
 0x214   : > { %4932 = vst [vmem:[#allocation24_spill] sm:$0xff] %v4461_v9  ;;  %3026 = vmatprep.subr.bf16.mxu1 %v3238_v57 }
 0x215   : > { %3027 = vmatpush3.bf16.msra.mxu1 %v3238_v57  ;;  %v3242_v57 = vld [vmem:[%s4897_s11 + $0x28] sm:$0xff]  }
 0x218   : > { %v4463_v42 = vpop.f32.mrb[60].mxu0 }
 0x219   : > { %4933 = vst [vmem:[#allocation25_spill] sm:$0xff] %v4463_v42  ;;  %v4465_v24 = vpop.f32.mrb[61].mxu0 }
 0x21a   : > { %4934 = vst [vmem:[#allocation26_spill] sm:$0xff] %v4465_v24  ;;  %v4467_v27 = vpop.f32.mrb[62].mxu0  ;;  %v3239_v24 = vld [vmem:[%s4897_s11 + $0x10] sm:$0xff]  }
 0x21b   : > { %4935 = vst [vmem:[#allocation27_spill] sm:$0xff] %v4467_v27  ;;  %v4469_v22 = vpop.f32.mrb[63].mxu0  ;;  %3028 = vmatprep.subr.bf16.mxu1 %v3239_v24  ;;  %v982_v27 = vsub.s32 3, %v4143_v25 }
 0x21c   : > { %4936 = vst [vmem:[#allocation28_spill] sm:$0xff] %v4469_v22  ;;  %3029 = vmatpush3.bf16.msra.mxu1 %v3239_v24  ;;  %v3240_v22 = vld [vmem:[%s4897_s11 + $0x18] sm:$0xff]   ;;  %v3243_v24 = vld [vmem:[%s4897_s11 + $0x30] sm:$0xff]  }
 0x21d   : > { %3030 = vmatprep.subr.bf16.mxu1 %v3240_v22 }
 0x220   : > { %3031 = vmatpush3.bf16.msra.mxu1 %v3240_v22  ;;  %v3244_v22 = vld [vmem:[%s4897_s11 + $0x38] sm:$0xff]  }
 0x221   : > { %3032 = vmatprep.subr.bf16.mxu1 %v3241_v23 }
 0x224   : > { %3033 = vmatpush3.bf16.msra.mxu1 %v3241_v23  ;;  %v978_v23 = vsub.s32 2, %v4143_v25 }
 0x225   : > { %3034 = vmatprep.subr.bf16.mxu1 %v3242_v57 }
 0x226   : > { %v4498_v42 = vrot.slane %v4156_v34, %v978_v23 }
 0x228   : > { %3035 = vmatpush3.bf16.msra.mxu1 %v3242_v57  ;;  %v4503_v57 = vld [vmem:[%s4896_s10] ss:$0 sm:$0xff]  ;;  %v1396_v29 = vadd.f32 %v4210_v10, %v4498_v42  ;;  %v1386_v40 = vadd.f32 %v4182_v45, %v4498_v42 }
 0x229   : > { %3036 = vmatprep.subr.bf16.mxu1 %v3243_v24 }
 0x22c   : > { %3037 = vmatpush3.bf16.msra.mxu1 %v3243_v24  ;;  %v4506_v24 = vrot.slane %v4156_v34, %v982_v27  ;;  %v1400_v34 = vadd.f32 %v4219_v36, %v4498_v42 }
 0x22d   : > { %3038 = vmatprep.subr.bf16.mxu1 %v3244_v22 }
 0x22e   : > { %v1398_v26 = vadd.f32 %v4216_v31, %v4506_v24  ;;  %v1388_v10 = vadd.f32 %v4186_v49, %v4506_v24  ;;  %v1402_v28 = vadd.f32 %v4222_v46, %v4506_v24  ;;  %v1392_v36 = vadd.f32 %v4192_v61, %v4506_v24 }
 0x230   : > { %3039 = vmatpush3.bf16.msra.mxu1 %v3244_v22 }
 0x2a4   : > { %v3010_v9 = vpop.f32.mrb[32].mxu1 }
 0x2a5   : > { %v2068_v22 = vadd.f32 %v3010_v9, %v4503_v57  ;;  %v2059_v20 = vpop.f32.mrb[33].mxu1  ;;  %v1390_v9 = vadd.f32 %v4189_v53, %v4498_v42 }
 0x2a6   : > { %v2060_v23 = vadd.f32 %v4503_v57, %v2059_v20  ;;  %v3011_v44 = vpop.f32.mrb[34].mxu1 }
 0x2a7   : > { %v2124_v27 = vmul.f32 %v2068_v22, %v1396_v29  ;;  %v2071_v17 = vadd.f32 %v3011_v44, %v4503_v57  ;;  %v2062_v37 = vpop.f32.mrb[35].mxu1 }
 0x2a8   : > { %v2122_v45 = vmul.f32 %v2060_v23, %v1386_v40  ;;  %v2063_v20 = vadd.f32 %v4503_v57, %v2062_v37 }
 0x2a9   : > { %v4526_v31 = vadd.f32 %v2124_v27, %v1398_v26  ;;  %v2125_v39 = vmul.f32 %v2071_v17, %v1400_v34 }
 0x2aa   : > { %v4530_v44 = vadd.f32 %v2122_v45, %v1388_v10  ;;  %v2123_v29 = vmul.f32 %v2063_v20, %v1390_v9  ;;  %v1406_v10 = vadd.f32 %v4241_v8, %v4498_v42  ;;  %v1418_v20 = vadd.f32 %v4274_v18, %v4506_v24 }
 0x2ab   : > { %v2156_v49 = vsub.f32 0.0, %v4526_v31  ;;  %v4533_v22 = vadd.f32 %v2125_v39, %v1402_v28  ;;  %v1416_v39 = vadd.f32 %v4270_v63, %v4498_v42  ;;  %v1408_v63 = vadd.f32 %v4245_v7, %v4506_v24 }
 0x2ac   : > { %v2154_v53 = vsub.f32 0.0, %v4530_v44  ;;  %v4536_v40 = vadd.f32 %v2123_v29, %v1392_v36  ;;  %v1420_v36 = vadd.f32 %v4277_v0, %v4498_v42  ;;  %v1422_v18 = vadd.f32 %v4280_v13, %v4506_v24 }
 0x2ad   : > { %v2174_v37 = vmul.f32 1.442695, %v2156_v49  ;;  %v2157_v46 = vsub.f32 0.0, %v4533_v22 }
 0x2ae   : > { %v2170_v26 = vmul.f32 1.442695, %v2154_v53  ;;  %v2155_v17 = vsub.f32 0.0, %v4536_v40 }
 0x2af   : > { %3381 = vpow2.f32 %v2174_v37  ;;  %v2176_v23 = vmul.f32 1.442695, %v2157_v46  ;;  %v1410_v37 = vadd.f32 %v4250_v14, %v4498_v42 }
 0x2b0   : > { %3383 = vpow2.f32 %v2170_v26  ;;  %v2172_v61 = vmul.f32 1.442695, %v2155_v17 }
 0x2b1   : > { %3385 = vpow2.f32 %v2176_v23 }
 0x2b2   : > { %3387 = vpow2.f32 %v2172_v61  ;;  %v1412_v61 = vadd.f32 %v4253_v19, %v4506_v24 }
 0x2b4   : > { %v3014_v34 = vpop.f32.mrb[36].mxu1 }
 0x2b5   : > { %v2084_v28 = vadd.f32 %v3014_v34, %v4503_v57  ;;  %v2075_v27 = vpop.f32.mrb[37].mxu1 }
 0x2b6   : > { %v2076_v9 = vadd.f32 %v4503_v57, %v2075_v27  ;;  %v3015_v45 = vpop.f32.mrb[38].mxu1 }
 0x2b7   : > { %v2128_v29 = vmul.f32 %v2084_v28, %v1416_v39  ;;  %v2087_v49 = vadd.f32 %v3015_v45, %v4503_v57  ;;  %v2078_v53 = vpop.f32.mrb[39].mxu1 }
 0x2b8   : > { %v2126_v8 = vmul.f32 %v2076_v9, %v1406_v10  ;;  %v2079_v46 = vadd.f32 %v4503_v57, %v2078_v53 }
 0x2b9   : > { %v3382_v26 = vpop.eup %3381  ;;  %v4558_v17 = vadd.f32 %v2128_v29, %v1418_v20  ;;  %v2129_v0 = vmul.f32 %v2087_v49, %v1420_v36 }
 0x2ba   : > { %v3384_v23 = vpop.eup %3383  ;;  %v2204_v34 = vadd.f32 1.0, %v3382_v26  ;;  %v4562_v39 = vadd.f32 %v2126_v8, %v1408_v63  ;;  %v2127_v7 = vmul.f32 %v2079_v46, %v1410_v37  ;;  %v1426_v26 = vadd.f32 %v4299_v58, %v4498_v42 }
 0x2bb   : > { %v3386_v28 = vpop.eup %3385  ;;  %v2202_v14 = vadd.f32 1.0, %v3384_v23  ;;  %v2160_v27 = vsub.f32 0.0, %v4558_v17  ;;  %v4565_v10 = vadd.f32 %v2129_v0, %v1422_v18  ;;  %v1428_v18 = vadd.f32 %v4303_v5, %v4506_v24 }
 0x2bc   : > { %v3388_v9 = vpop.eup %3387  ;;  %3389 = vrcp.f32 %v2204_v34  ;;  %v2205_v13 = vadd.f32 1.0, %v3386_v28  ;;  %v2158_v45 = vsub.f32 0.0, %v4562_v39  ;;  %v4568_v20 = vadd.f32 %v2127_v7, %v1412_v61 }
 0x2bd   : > { %3391 = vrcp.f32 %v2202_v14  ;;  %v2203_v36 = vadd.f32 1.0, %v3388_v9  ;;  %v2182_v19 = vmul.f32 1.442695, %v2160_v27  ;;  %v2161_v29 = vsub.f32 0.0, %v4565_v10  ;;  %v4937_v14 = vld [vmem:[#allocation10_spill] sm:$0xff] }
 0x2be   : > { %3393 = vrcp.f32 %v2205_v13  ;;  %v2178_v49 = vmul.f32 1.442695, %v2158_v45  ;;  %v2159_v53 = vsub.f32 0.0, %v4568_v20  ;;  %v1436_v0 = vadd.f32 %v4328_v6, %v4498_v42  ;;  %v4938_v13 = vld [vmem:[#allocation11_spill] sm:$0xff] }
 0x2bf   : > { %3395 = vrcp.f32 %v2203_v36  ;;  %v2184_v63 = vmul.f32 1.442695, %v2161_v29  ;;  %v1430_v7 = vadd.f32 %v4307_v15, %v4498_v42  ;;  %v1432_v28 = vadd.f32 %v4310_v47, %v4506_v24 }
 0x2c0   : > { %3397 = vpow2.f32 %v2182_v19  ;;  %v2180_v37 = vmul.f32 1.442695, %v2159_v53  ;;  %v1438_v27 = vadd.f32 %v4937_v14, %v4506_v24  ;;  %v1440_v6 = vadd.f32 %v4938_v13, %v4498_v42 }
 0x2c1   : > { %3399 = vpow2.f32 %v2178_v49  ;;  %v1442_v45 = vadd.f32 %v4340_v51, %v4506_v24 }
 0x2c2   : > { %3401 = vpow2.f32 %v2184_v63 }
 0x2c3   : > { %3403 = vpow2.f32 %v2180_v37 }
 0x2c4   : > { %v3018_v8 = vpop.f32.mrb[40].mxu1 }
 0x2c5   : > { %v2100_v23 = vadd.f32 %v3018_v8, %v4503_v57  ;;  %v2091_v61 = vpop.f32.mrb[41].mxu1 }
 0x2c6   : > { %v3390_v46 = vpop.eup %3389  ;;  %v2092_v58 = vadd.f32 %v4503_v57, %v2091_v61  ;;  %v3019_v9 = vpop.f32.mrb[42].mxu1 }
 0x2c7   : > { %v3392_v34 = vpop.eup %3391  ;;  %v2132_v36 = vmul.f32 %v2100_v23, %v1436_v0  ;;  %v2103_v19 = vadd.f32 %v3019_v9, %v4503_v57  ;;  %v2094_v15 = vpop.f32.mrb[43].mxu1  ;;  %v2236_v47 = vmul.f32 %v3390_v46, %v4526_v31 }
 0x2c8   : > { %v3394_v5 = vpop.eup %3393  ;;  %v2130_v53 = vmul.f32 %v2092_v58, %v1426_v26  ;;  %v2095_v63 = vadd.f32 %v4503_v57, %v2094_v15  ;;  %v2234_v14 = vmul.f32 %v3392_v34, %v4530_v44 }
 0x2c9   : > { %v3396_v29 = vpop.eup %3395  ;;  %v2237_v49 = vmul.f32 %v3394_v5, %v4533_v22  ;;  %v4594_v8 = vadd.f32 %v2132_v36, %v1438_v27  ;;  %v2133_v61 = vmul.f32 %v2103_v19, %v1440_v6 }
 0x2ca   : > { %v3398_v37 = vpop.eup %3397  ;;  %v2235_v51 = vmul.f32 %v3396_v29, %v4536_v40  ;;  %v4598_v13 = vadd.f32 %v2130_v53, %v1428_v18  ;;  %v2131_v48 = vmul.f32 %v2095_v63, %v1430_v7  ;;  %v1448_v53 = vadd.f32 %v4359_v33, %v4506_v24  ;;  %v4939_v33 = vld [vmem:[#allocation12_spill] sm:$0xff] }
 0x2cb   : > { %v3400_v0 = vpop.eup %3399  ;;  %v2251_v23 = vpack.c.bf16 %v2237_v49, %v2236_v47  ;;  %v2208_v9 = vadd.f32 1.0, %v3398_v37  ;;  %v2164_v22 = vsub.f32 0.0, %v4594_v8  ;;  %v4601_v26 = vadd.f32 %v2133_v61, %v1442_v45 }
 0x2cc   : > { %v3402_v31 = vpop.eup %3401  ;;  %v2206_v46 = vadd.f32 1.0, %v3400_v0  ;;  %v2250_v58 = vpack.c.bf16 %v2235_v51, %v2234_v14  ;;  %v2162_v44 = vsub.f32 0.0, %v4598_v13  ;;  %v4604_v34 = vadd.f32 %v2131_v48, %v1432_v28 }
 0x2cd   : > { %v3404_v27 = vpop.eup %3403  ;;  %3405 = vrcp.f32 %v2208_v9  ;;  %v2209_v5 = vadd.f32 1.0, %v3402_v31  ;;  %v2190_v6 = vmul.f32 1.442695, %v2164_v22  ;;  %v2165_v18 = vsub.f32 0.0, %v4601_v26 }
 0x2ce   : > { %3407 = vrcp.f32 %v2206_v46  ;;  %v2207_v40 = vadd.f32 1.0, %v3404_v27  ;;  %3040 = vmatprep.mubr.bf16.mxu1 %v2250_v58  ;;  %v2186_v7 = vmul.f32 1.442695, %v2162_v44  ;;  %v2163_v36 = vsub.f32 0.0, %v4604_v34 }
 0x2cf   : > { %3409 = vrcp.f32 %v2209_v5  ;;  %3041 = vmatmul.mubr.bf16.vlgmr.msra.gmra.mrb[48].mxu1 %v2251_v23  ;;  %v2192_v45 = vmul.f32 1.442695, %v2165_v18  ;;  %v1456_v28 = vadd.f32 %v4382_v21, %v4498_v42  ;;  %v1446_v49 = vadd.f32 %v4355_v12, %v4498_v42 }
 0x2d0   : > { %3411 = vrcp.f32 %v2207_v40  ;;  %v2188_v19 = vmul.f32 1.442695, %v2163_v36  ;;  %v1450_v63 = vadd.f32 %v4364_v43, %v4498_v42  ;;  %v1458_v21 = vadd.f32 %v4386_v11, %v4506_v24 }
 0x2d1   : > { %3413 = vpow2.f32 %v2190_v6  ;;  %v1460_v51 = vadd.f32 %v4389_v32, %v4498_v42  ;;  %v1452_v31 = vadd.f32 %v4939_v33, %v4506_v24  ;;  %v1462_v43 = vadd.f32 %v4391_v55, %v4506_v24 }
 0x2d2   : > { %3415 = vpow2.f32 %v2186_v7 }
 0x2d3   : > { %3417 = vpow2.f32 %v2192_v45 }
 0x2d4   : > { %3419 = vpow2.f32 %v2188_v19  ;;  %v3022_v48 = vpop.f32.mrb[44].mxu1 }
 0x2d5   : > { %v2116_v15 = vadd.f32 %v3022_v48, %v4503_v57  ;;  %v2107_v29 = vpop.f32.mrb[45].mxu1 }
 0x2d6   : > { %v2108_v37 = vadd.f32 %v4503_v57, %v2107_v29  ;;  %v3023_v61 = vpop.f32.mrb[46].mxu1 }
 0x2d7   : > { %v3406_v47 = vpop.eup %3405  ;;  %v2136_v0 = vmul.f32 %v2116_v15, %v1456_v28  ;;  %v2119_v23 = vadd.f32 %v3023_v61, %v4503_v57  ;;  %v2110_v12 = vpop.f32.mrb[47].mxu1 }
 0x2d8   : > { %v3408_v14 = vpop.eup %3407  ;;  %v2134_v46 = vmul.f32 %v2108_v37, %v1446_v49  ;;  %v2111_v22 = vadd.f32 %v4503_v57, %v2110_v12  ;;  %v2240_v32 = vmul.f32 %v3406_v47, %v4558_v17 }
 0x2d9   : > { %v3410_v9 = vpop.eup %3409  ;;  %v4628_v27 = vadd.f32 %v2136_v0, %v1458_v21  ;;  %v2137_v11 = vmul.f32 %v2119_v23, %v1460_v51  ;;  %v2238_v6 = vmul.f32 %v3408_v14, %v4562_v39 }
 0x2da   : > { %v3412_v58 = vpop.eup %3411  ;;  %v2241_v42 = vmul.f32 %v3410_v9, %v4565_v10  ;;  %v4632_v44 = vadd.f32 %v2134_v46, %v1448_v53  ;;  %v2135_v40 = vmul.f32 %v2111_v22, %v1450_v63 }
 0x2db   : > { %v3414_v5 = vpop.eup %3413  ;;  %v2239_v18 = vmul.f32 %v3412_v58, %v4568_v20  ;;  %v2168_v57 = vsub.f32 0.0, %v4628_v27  ;;  %v2153_v7 = vadd.f32 %v2137_v11, %v1462_v43 }
 0x2dc   : > { %v3416_v55 = vpop.eup %3415  ;;  %v2212_v24 = vadd.f32 1.0, %v3414_v5  ;;  %v2253_v36 = vpack.c.bf16 %v2241_v42, %v2240_v32  ;;  %v2166_v17 = vsub.f32 0.0, %v4632_v44  ;;  %v2151_v48 = vadd.f32 %v2135_v40, %v1452_v31 }
 0x2dd   : > { %v3418_v45 = vpop.eup %3417  ;;  %v2210_v19 = vadd.f32 1.0, %v3416_v55  ;;  %v2252_v10 = vpack.c.bf16 %v2239_v18, %v2238_v6  ;;  %v2198_v29 = vmul.f32 1.442695, %v2168_v57  ;;  %v2169_v47 = vsub.f32 0.0, %v2153_v7  ;;  %v3245_v57 = vld [vmem:[%s4899_s13] sm:$0xff]  }
 0x2de   : > { %v3420_v28 = vpop.eup %3419  ;;  %3421 = vrcp.f32 %v2212_v24  ;;  %v2213_v15 = vadd.f32 1.0, %v3418_v45  ;;  %v2194_v20 = vmul.f32 1.442695, %v2166_v17  ;;  %v2167_v49 = vsub.f32 0.0, %v2151_v48  ;;  %3056 = vmatprep.subr.bf16.mxu0 %v3245_v57  ;;  %3088 = vmatprep.subr.bf16.mxu1 %v3245_v57  ;;  %v3250_v45 = vld [vmem:[%s4899_s13 + $0x28] sm:$0xff]   ;;  %v3252_v17 = vld [vmem:[%s4899_s13 + $0x38] sm:$0xff]  }
 0x2df   : > { %3423 = vrcp.f32 %v2210_v19  ;;  %v2211_v39 = vadd.f32 1.0, %v3420_v28  ;;  %3044 = vmatprep.mubr.bf16.mxu1 %v2252_v10  ;;  %v2200_v53 = vmul.f32 1.442695, %v2169_v47  ;;  %3057 = vmatpush3.bf16.msra.mxu0 %v3245_v57  ;;  %v3251_v19 = vld [vmem:[%s4899_s13 + $0x30] sm:$0xff]   ;;  %v990_v10 = vsub.s32 5, %v4143_v25 }
 0x2e0   : > { %3425 = vrcp.f32 %v2213_v15  ;;  %3045 = vmatmul.mubr.bf16.gmra.mrb[52].mxu1 %v2253_v36  ;;  %v2196_v63 = vmul.f32 1.442695, %v2167_v49  ;;  %v3249_v36 = vld [vmem:[%s4899_s13 + $0x20] sm:$0xff]  }
 0x2e1   : > { %3427 = vrcp.f32 %v2211_v39  ;;  %3096 = vmatpush3.bf16.msra.mxu1 %v3245_v57  ;;  %v3509_v28 = vld [vmem:[%s4892_s6] sm:$0x3f] }
 0x2e2   : > { %3429 = vpow2.f32 %v2198_v29  ;;  %v4678_v29 = vld [vmem:[%s4898_s12] ss:$0 sm:$0xff]  ;;  %v4680_v47 = vrot.slane %v3509_v28, %v990_v10 }
 0x2e3   : > { %3431 = vpow2.f32 %v2194_v20 }
 0x2e4   : > { %3433 = vpow2.f32 %v2200_v53  ;;  %v1525_v10 = vadd.f32 %v4426_v62, %v4680_v47 }
 0x2e5   : > { %3435 = vpow2.f32 %v2196_v63 }
 0x2e8   : > { %v3422_v37 = vpop.eup %3421 }
 0x2e9   : > { %v3424_v61 = vpop.eup %3423  ;;  %v2244_v51 = vmul.f32 %v3422_v37, %v4594_v8 }
 0x2ea   : > { %v3426_v14 = vpop.eup %3425  ;;  %v2242_v12 = vmul.f32 %v3424_v61, %v4598_v13  ;;  %v1511_v61 = vadd.f32 %v4412_v3, %v4680_v47 }
 0x2eb   : > { %v3428_v21 = vpop.eup %3427  ;;  %v2245_v0 = vmul.f32 %v3426_v14, %v4601_v26 }
 0x2ec   : > { %v3430_v23 = vpop.eup %3429  ;;  %v2243_v9 = vmul.f32 %v3428_v21, %v4604_v34 }
 0x2ed   : > { %v3432_v33 = vpop.eup %3431  ;;  %v2216_v31 = vadd.f32 1.0, %v3430_v23  ;;  %v2255_v43 = vpack.c.bf16 %v2245_v0, %v2244_v51 }
 0x2ee   : > { %v3434_v46 = vpop.eup %3433  ;;  %v2214_v22 = vadd.f32 1.0, %v3432_v33  ;;  %v2254_v58 = vpack.c.bf16 %v2243_v9, %v2242_v12  ;;  %v1515_v9 = vadd.f32 %v4416_v4, %v4680_v47 }
 0x2ef   : > { %v3436_v11 = vpop.eup %3435  ;;  %3437 = vrcp.f32 %v2216_v31  ;;  %v2217_v32 = vadd.f32 1.0, %v3434_v46 }
 0x2f0   : > { %3439 = vrcp.f32 %v2214_v22  ;;  %v2215_v42 = vadd.f32 1.0, %v3436_v11  ;;  %3048 = vmatprep.mubr.bf16.mxu1 %v2254_v58 }
 0x2f1   : > { %3441 = vrcp.f32 %v2217_v32  ;;  %3049 = vmatmul.mubr.bf16.gmra.mrb[56].mxu1 %v2255_v43 }
 0x2f2   : > { %3443 = vrcp.f32 %v2215_v42 }
 0x2f9   : > { %v3438_v8 = vpop.eup %3437 }
 0x2fa   : > { %v3440_v26 = vpop.eup %3439  ;;  %v2248_v34 = vmul.f32 %v3438_v8, %v4628_v27  ;;  %v3246_v27 = vld [vmem:[%s4899_s13 + $0x8] sm:$0xff]  }
 0x2fb   : > { %v3442_v13 = vpop.eup %3441  ;;  %v2246_v6 = vmul.f32 %v3440_v26, %v4632_v44  ;;  %3058 = vmatprep.subr.bf16.mxu0 %v3246_v27  ;;  %3089 = vmatprep.subr.bf16.mxu1 %v3246_v27  ;;  %v3247_v44 = vld [vmem:[%s4899_s13 + $0x10] sm:$0xff]  }
 0x2fc   : > { %v3444_v5 = vpop.eup %3443  ;;  %v2249_v40 = vmul.f32 %v3442_v13, %v2153_v7  ;;  %3059 = vmatpush3.bf16.msra.mxu0 %v3246_v27  ;;  %3097 = vmatpush3.bf16.msra.mxu1 %v3246_v27  ;;  %v3248_v7 = vld [vmem:[%s4899_s13 + $0x18] sm:$0xff]  }
 0x2fd   : > { %v2247_v18 = vmul.f32 %v3444_v5, %v2151_v48  ;;  %3060 = vmatprep.subr.bf16.mxu0 %v3247_v44  ;;  %3090 = vmatprep.subr.bf16.mxu1 %v3247_v44  ;;  %v986_v48 = vsub.s32 4, %v4143_v25 }
 0x2fe   : > { %v2257_v55 = vpack.c.bf16 %v2249_v40, %v2248_v34 }
 0x2ff   : > { %v2256_v24 = vpack.c.bf16 %v2247_v18, %v2246_v6  ;;  %v4673_v15 = vrot.slane %v3509_v28, %v986_v48  ;;  %v1531_v18 = vadd.f32 %v4432_v1, %v4680_v47  ;;  %v1535_v1 = vadd.f32 %v4436_v2, %v4680_v47 }
 0x300   : > { %3061 = vmatpush3.bf16.msra.mxu0 %v3247_v44  ;;  %3098 = vmatpush3.bf16.msra.mxu1 %v3247_v44  ;;  %v1521_v44 = vadd.f32 %v4422_v52, %v4680_v47 }
 0x301   : > { %3052 = vmatprep.mubr.bf16.mxu1 %v2256_v24  ;;  %3062 = vmatprep.subr.bf16.mxu0 %v3248_v7  ;;  %v1509_v20 = vadd.f32 %v4410_v56, %v4673_v15  ;;  %v1499_v53 = vadd.f32 %v4400_v59, %v4673_v15  ;;  %v1513_v14 = vadd.f32 %v4414_v30, %v4673_v15 }
 0x302   : > { %3053 = vmatmul.mubr.bf16.gmra.mrb[60].mxu1 %v2257_v55  ;;  %3091 = vmatprep.subr.bf16.mxu1 %v3248_v7  ;;  %v1501_v56 = vadd.f32 %v4402_v50, %v4680_v47  ;;  %v1503_v23 = vadd.f32 %v4404_v16, %v4673_v15  ;;  %v1505_v30 = vadd.f32 %v4406_v35, %v4680_v47 }
 0x303   : > { %v1529_v26 = vadd.f32 %v4430_v38, %v4673_v15  ;;  %v1519_v34 = vadd.f32 %v4420_v41, %v4673_v15  ;;  %v1533_v55 = vadd.f32 %v4434_v54, %v4673_v15  ;;  %v1523_v41 = vadd.f32 %v4424_v60, %v4673_v15 }
 0x304   : > { %3063 = vmatpush3.bf16.msra.mxu0 %v3248_v7  ;;  %3099 = vmatpush3.bf16.msra.mxu1 %v3248_v7 }
 0x305   : > { %3064 = vmatprep.subr.bf16.mxu0 %v3249_v36  ;;  %3092 = vmatprep.subr.bf16.mxu1 %v3249_v36 }
 0x308   : > { %3065 = vmatpush3.bf16.msra.mxu0 %v3249_v36  ;;  %3100 = vmatpush3.bf16.msra.mxu1 %v3249_v36 }
 0x309   : > { %3066 = vmatprep.subr.bf16.mxu0 %v3250_v45  ;;  %3093 = vmatprep.subr.bf16.mxu1 %v3250_v45 }
 0x30c   : > { %3067 = vmatpush3.bf16.msra.mxu0 %v3250_v45  ;;  %3101 = vmatpush3.bf16.msra.mxu1 %v3250_v45 }
 0x30d   : > { %3068 = vmatprep.subr.bf16.mxu0 %v3251_v19  ;;  %3094 = vmatprep.subr.bf16.mxu1 %v3251_v19 }
 0x310   : > { %3069 = vmatpush3.bf16.msra.mxu0 %v3251_v19  ;;  %3102 = vmatpush3.bf16.msra.mxu1 %v3251_v19 }
 0x311   : > { %3070 = vmatprep.subr.bf16.mxu0 %v3252_v17  ;;  %3095 = vmatprep.subr.bf16.mxu1 %v3252_v17 }
 0x314   : > { %3071 = vmatpush3.bf16.msra.mxu0 %v3252_v17  ;;  %3103 = vmatpush3.bf16.msra.mxu1 %v3252_v17 }
 0x3a2   : > { %v3042_v39 = vpop.f32.mrb[48].mxu1 }
 0x3a3   : > { %v2372_v49 = vadd.f32 %v3042_v39, %v4678_v29  ;;  %v2363_v25 = vpop.f32.mrb[49].mxu1 }
 0x3a4   : > { %v2364_v63 = vadd.f32 %v4678_v29, %v2363_v25  ;;  %v3043_v37 = vpop.f32.mrb[50].mxu1 }
 0x3a5   : > { %v2428_v21 = vmul.f32 %v2372_v49, %v1509_v20  ;;  %v2375_v51 = vadd.f32 %v3043_v37, %v4678_v29  ;;  %v2366_v0 = vpop.f32.mrb[51].mxu1 }
 0x3a6   : > { %v2426_v59 = vmul.f32 %v2364_v63, %v1499_v53  ;;  %v2367_v12 = vadd.f32 %v4678_v29, %v2366_v0 }
 0x3a7   : > { %v4700_v3 = vadd.f32 %v2428_v21, %v1511_v61  ;;  %v2429_v33 = vmul.f32 %v2375_v51, %v1513_v14 }
 0x3a8   : > { %v4704_v31 = vadd.f32 %v2426_v59, %v1501_v56  ;;  %v2427_v43 = vmul.f32 %v2367_v12, %v1503_v23  ;;  %v4940_v56 = vld [vmem:[#allocation13_spill] sm:$0xff]  ;;  %v4941_v59 = vld [vmem:[#allocation14_spill] sm:$0xff] }
 0x3a9   : > { %v2460_v50 = vsub.f32 0.0, %v4700_v3  ;;  %v4707_v46 = vadd.f32 %v2429_v33, %v1515_v9  ;;  %v1539_v23 = vadd.f32 %v4940_v56, %v4673_v15  ;;  %v1541_v12 = vadd.f32 %v4941_v59, %v4680_v47 }
 0x3aa   : > { %v2458_v16 = vsub.f32 0.0, %v4704_v31  ;;  %v4710_v22 = vadd.f32 %v2427_v43, %v1505_v30  ;;  %v4942_v30 = vld [vmem:[#allocation15_spill] sm:$0xff] }
 0x3ab   : > { %v2478_v58 = vmul.f32 1.442695, %v2460_v50  ;;  %v2461_v4 = vsub.f32 0.0, %v4707_v46  ;;  %v1543_v43 = vadd.f32 %v4942_v30, %v4673_v15  ;;  %v4943_v50 = vld [vmem:[#allocation16_spill] sm:$0xff] }
 0x3ac   : > { %v2474_v11 = vmul.f32 1.442695, %v2458_v16  ;;  %v2459_v32 = vsub.f32 0.0, %v4710_v22  ;;  %v1545_v16 = vadd.f32 %v4943_v50, %v4680_v47 }
 0x3ad   : > { %3445 = vpow2.f32 %v2478_v58  ;;  %v2480_v42 = vmul.f32 1.442695, %v2461_v4  ;;  %v4944_v58 = vld [vmem:[#allocation17_spill] sm:$0xff] }
 0x3ae   : > { %3447 = vpow2.f32 %v2474_v11  ;;  %v2476_v35 = vmul.f32 1.442695, %v2459_v32  ;;  %v1549_v4 = vadd.f32 %v4944_v58, %v4673_v15 }
 0x3af   : > { %3449 = vpow2.f32 %v2480_v42 }
 0x3b0   : > { %3451 = vpow2.f32 %v2476_v35  ;;  %v4945_v35 = vld [vmem:[#allocation18_spill] sm:$0xff] }
 0x3b3   : > { %v3046_v8 = vpop.f32.mrb[52].mxu1 }
 0x3b4   : > { %v2388_v13 = vadd.f32 %v3046_v8, %v4678_v29  ;;  %v2379_v5 = vpop.f32.mrb[53].mxu1  ;;  %v1551_v8 = vadd.f32 %v4945_v35, %v4680_v47 }
 0x3b5   : > { %v2380_v40 = vadd.f32 %v4678_v29, %v2379_v5  ;;  %v3047_v6 = vpop.f32.mrb[54].mxu1  ;;  %v4947_v5 = vld [vmem:[#allocation20_spill] sm:$0xff] }
 0x3b6   : > { %v2432_v24 = vmul.f32 %v2388_v13, %v1529_v26  ;;  %v2391_v57 = vadd.f32 %v3047_v6, %v4678_v29  ;;  %v2382_v27 = vpop.f32.mrb[55].mxu1  ;;  %v4946_v26 = vld [vmem:[#allocation19_spill] sm:$0xff] }
 0x3b7   : > { %v3446_v38 = vpop.eup %3445  ;;  %v2430_v7 = vmul.f32 %v2380_v40, %v1519_v34  ;;  %v2383_v36 = vadd.f32 %v4678_v29, %v2382_v27  ;;  %v1553_v13 = vadd.f32 %v4946_v26, %v4673_v15  ;;  %v1555_v34 = vadd.f32 %v4947_v5, %v4680_v47 }
 0x3b8   : > { %v3448_v45 = vpop.eup %3447  ;;  %v2508_v19 = vadd.f32 1.0, %v3446_v38  ;;  %v4732_v54 = vadd.f32 %v2432_v24, %v1531_v18  ;;  %v2433_v17 = vmul.f32 %v2391_v57, %v1533_v55 }
 0x3b9   : > { %v3450_v48 = vpop.eup %3449  ;;  %v2506_v28 = vadd.f32 1.0, %v3448_v45  ;;  %v4736_v52 = vadd.f32 %v2430_v7, %v1521_v44  ;;  %v2431_v39 = vmul.f32 %v2383_v36, %v1523_v41 }
 0x3ba   : > { %v3452_v60 = vpop.eup %3451  ;;  %3453 = vrcp.f32 %v2508_v19  ;;  %v2509_v20 = vadd.f32 1.0, %v3450_v48  ;;  %v2464_v49 = vsub.f32 0.0, %v4732_v54  ;;  %v4739_v25 = vadd.f32 %v2433_v17, %v1535_v1 }
 0x3bb   : > { %3455 = vrcp.f32 %v2506_v28  ;;  %v2507_v2 = vadd.f32 1.0, %v3452_v60  ;;  %v2462_v53 = vsub.f32 0.0, %v4736_v52  ;;  %v4742_v63 = vadd.f32 %v2431_v39, %v1525_v10 }
 0x3bc   : > { %3457 = vrcp.f32 %v2509_v20  ;;  %v2486_v37 = vmul.f32 1.442695, %v2464_v49  ;;  %v2465_v62 = vsub.f32 0.0, %v4739_v25 }
 0x3bd   : > { %3459 = vrcp.f32 %v2507_v2  ;;  %v2482_v61 = vmul.f32 1.442695, %v2462_v53  ;;  %v2463_v14 = vsub.f32 0.0, %v4742_v63 }
 0x3be   : > { %3461 = vpow2.f32 %v2486_v37  ;;  %v2488_v21 = vmul.f32 1.442695, %v2465_v62 }
 0x3bf   : > { %3463 = vpow2.f32 %v2482_v61  ;;  %v2484_v51 = vmul.f32 1.442695, %v2463_v14 }
 0x3c0   : > { %3465 = vpow2.f32 %v2488_v21 }
 0x3c1   : > { %3467 = vpow2.f32 %v2484_v51 }
 0x3c4   : > { %v3454_v0 = vpop.eup %3453  ;;  %v3050_v9 = vpop.f32.mrb[56].mxu1 }
 0x3c5   : > { %v3456_v33 = vpop.eup %3455  ;;  %v2404_v11 = vadd.f32 %v3050_v9, %v4678_v29  ;;  %v2395_v32 = vpop.f32.mrb[57].mxu1  ;;  %v2540_v55 = vmul.f32 %v3454_v0, %v4700_v3 }
 0x3c6   : > { %v3458_v42 = vpop.eup %3457  ;;  %v2396_v40 = vadd.f32 %v4678_v29, %v2395_v32  ;;  %v3051_v6 = vpop.f32.mrb[58].mxu1  ;;  %v2538_v36 = vmul.f32 %v3456_v33, %v4704_v31 }
 0x3c7   : > { %v3460_v18 = vpop.eup %3459  ;;  %v2541_v24 = vmul.f32 %v3458_v42, %v4707_v46  ;;  %v2436_v57 = vmul.f32 %v2404_v11, %v1549_v4  ;;  %v2407_v27 = vadd.f32 %v3051_v6, %v4678_v29  ;;  %v2398_v38 = vpop.f32.mrb[59].mxu1  ;;  %v4952_v4 = vld [vmem:[#allocation25_spill] sm:$0xff] }
 0x3c8   : > { %v3462_v44 = vpop.eup %3461  ;;  %v2434_v41 = vmul.f32 %v2396_v40, %v1539_v23  ;;  %v2399_v7 = vadd.f32 %v4678_v29, %v2398_v38  ;;  %v2539_v45 = vmul.f32 %v3460_v18, %v4710_v22  ;;  %v4948_v23 = vld [vmem:[#allocation21_spill] sm:$0xff]  ;;  %v1569_v11 = vadd.f32 %v4952_v4, %v4673_v15 }
 0x3c9   : > { %v3464_v1 = vpop.eup %3463  ;;  %v2555_v19 = vpack.c.bf16 %v2541_v24, %v2540_v55  ;;  %v2512_v17 = vadd.f32 1.0, %v3462_v44  ;;  %v4770_v48 = vadd.f32 %v2436_v57, %v1551_v8  ;;  %v2437_v3 = vmul.f32 %v2407_v27, %v1553_v13  ;;  %v4953_v8 = vld [vmem:[#allocation26_spill] sm:$0xff]  ;;  %v4954_v13 = vld [vmem:[#allocation27_spill] sm:$0xff] }
 0x3ca   : > { %v3466_v10 = vpop.eup %3465  ;;  %v2510_v46 = vadd.f32 1.0, %v3464_v1  ;;  %v4772_v28 = vadd.f32 %v2434_v41, %v1541_v12  ;;  %v2435_v39 = vmul.f32 %v2399_v7, %v1543_v43  ;;  %v2554_v60 = vpack.c.bf16 %v2539_v45, %v2538_v36  ;;  %v4949_v12 = vld [vmem:[#allocation22_spill] sm:$0xff]  ;;  %v4950_v43 = vld [vmem:[#allocation23_spill] sm:$0xff] }
 0x3cb   : > { %v3468_v20 = vpop.eup %3467  ;;  %3469 = vrcp.f32 %v2512_v17  ;;  %v2513_v49 = vadd.f32 1.0, %v3466_v10  ;;  %v2468_v2 = vsub.f32 0.0, %v4770_v48  ;;  %v4775_v31 = vadd.f32 %v2437_v3, %v1555_v34  ;;  %v4955_v34 = vld [vmem:[#allocation28_spill] sm:$0xff] }
 0x3cc   : > { %3471 = vrcp.f32 %v2510_v46  ;;  %v2511_v22 = vadd.f32 1.0, %v3468_v20  ;;  %v2466_v53 = vsub.f32 0.0, %v4772_v28  ;;  %v4778_v37 = vadd.f32 %v2435_v39, %v1545_v16  ;;  %3072 = vmatprep.mubr.bf16.mxu0 %v2554_v60  ;;  %v4951_v16 = vld [vmem:[#allocation24_spill] sm:$0xff] }
 0x3cd   : > { %3473 = vrcp.f32 %v2513_v49  ;;  %v2494_v62 = vmul.f32 1.442695, %v2468_v2  ;;  %v2469_v61 = vsub.f32 0.0, %v4775_v31  ;;  %3073 = vmatmul.mubr.bf16.vlgmr.msra.gmra.mrb[64].mxu0 %v2555_v19  ;;  %v1559_v59 = vadd.f32 %v4948_v23, %v4673_v15 }
 0x3ce   : > { %3475 = vrcp.f32 %v2511_v22  ;;  %v2490_v14 = vmul.f32 1.442695, %v2466_v53  ;;  %v2467_v21 = vsub.f32 0.0, %v4778_v37  ;;  %v1561_v9 = vadd.f32 %v4949_v12, %v4680_v47 }
 0x3cf   : > { %3477 = vpow2.f32 %v2494_v62  ;;  %v2496_v51 = vmul.f32 1.442695, %v2469_v61  ;;  %v1563_v50 = vadd.f32 %v4950_v43, %v4673_v15  ;;  %v1565_v58 = vadd.f32 %v4951_v16, %v4680_v47 }
 0x3d0   : > { %3479 = vpow2.f32 %v2490_v14  ;;  %v2492_v0 = vmul.f32 1.442695, %v2467_v21  ;;  %v1571_v26 = vadd.f32 %v4953_v8, %v4680_v47  ;;  %v1573_v5 = vadd.f32 %v4954_v13, %v4673_v15 }
 0x3d1   : > { %3481 = vpow2.f32 %v2496_v51  ;;  %v1575_v40 = vadd.f32 %v4955_v34, %v4680_v47 }
 0x3d2   : > { %3483 = vpow2.f32 %v2492_v0 }
 0x3d5   : > { %v3470_v56 = vpop.eup %3469  ;;  %v3054_v33 = vpop.f32.mrb[60].mxu1 }
 0x3d6   : > { %v3472_v30 = vpop.eup %3471  ;;  %v2420_v32 = vadd.f32 %v3054_v33, %v4678_v29  ;;  %v2411_v42 = vpop.f32.mrb[61].mxu1  ;;  %v2544_v38 = vmul.f32 %v3470_v56, %v4732_v54 }
 0x3d7   : > { %v3474_v35 = vpop.eup %3473  ;;  %v2412_v6 = vadd.f32 %v4678_v29, %v2411_v42  ;;  %v3055_v18 = vpop.f32.mrb[62].mxu1  ;;  %v2542_v15 = vmul.f32 %v3472_v30, %v4736_v52 }
 0x3d8   : > { %v3476_v55 = vpop.eup %3475  ;;  %v2440_v24 = vmul.f32 %v2420_v32, %v1569_v11  ;;  %v2423_v57 = vadd.f32 %v3055_v18, %v4678_v29  ;;  %v2414_v27 = vpop.f32.mrb[63].mxu1  ;;  %v2545_v44 = vmul.f32 %v3474_v35, %v4739_v25 }
 0x3d9   : > { %v3478_v41 = vpop.eup %3477  ;;  %v2438_v7 = vmul.f32 %v2412_v6, %v1559_v59  ;;  %v2415_v36 = vadd.f32 %v4678_v29, %v2414_v27  ;;  %v2543_v47 = vmul.f32 %v3476_v55, %v4742_v63  ;;  %v2929_v6 = vld [vmem:[%s4900_s14] ss:$0 sm:$0xff] }
 0x3da   : > { %v3480_v45 = vpop.eup %3479  ;;  %v2516_v1 = vadd.f32 1.0, %v3478_v41  ;;  %v2456_v19 = vadd.f32 %v2440_v24, %v1571_v26  ;;  %v2441_v17 = vmul.f32 %v2423_v57, %v1573_v5  ;;  %v2557_v3 = vpack.c.bf16 %v2545_v44, %v2544_v38 }
 0x3db   : > { %v3482_v10 = vpop.eup %3481  ;;  %v2514_v46 = vadd.f32 1.0, %v3480_v45  ;;  %v2454_v39 = vadd.f32 %v2438_v7, %v1561_v9  ;;  %v2439_v60 = vmul.f32 %v2415_v36, %v1563_v50  ;;  %v2556_v54 = vpack.c.bf16 %v2543_v47, %v2542_v15 }
 0x3dc   : > { %v3484_v20 = vpop.eup %3483  ;;  %3485 = vrcp.f32 %v2516_v1  ;;  %v2517_v25 = vadd.f32 1.0, %v3482_v10  ;;  %v2472_v49 = vsub.f32 0.0, %v2456_v19  ;;  %v2457_v2 = vadd.f32 %v2441_v17, %v1575_v40 }
 0x3dd   : > { %3487 = vrcp.f32 %v2514_v46  ;;  %v2515_v29 = vadd.f32 1.0, %v3484_v20  ;;  %v2470_v52 = vsub.f32 0.0, %v2454_v39  ;;  %v2455_v22 = vadd.f32 %v2439_v60, %v1565_v58  ;;  %3076 = vmatprep.mubr.bf16.mxu0 %v2556_v54 }
 0x3de   : > { %3489 = vrcp.f32 %v2517_v25  ;;  %v2502_v63 = vmul.f32 1.442695, %v2472_v49  ;;  %v2473_v53 = vsub.f32 0.0, %v2457_v2  ;;  %3077 = vmatmul.mubr.bf16.gmra.mrb[68].mxu0 %v2557_v3 }
 0x3df   : > { %3491 = vrcp.f32 %v2515_v29  ;;  %v2498_v62 = vmul.f32 1.442695, %v2470_v52  ;;  %v2471_v61 = vsub.f32 0.0, %v2455_v22 }
 0x3e0   : > { %3493 = vpow2.f32 %v2502_v63  ;;  %v2504_v14 = vmul.f32 1.442695, %v2473_v53 }
 0x3e1   : > { %3495 = vpow2.f32 %v2498_v62  ;;  %v2500_v21 = vmul.f32 1.442695, %v2471_v61 }
 0x3e2   : > { %3497 = vpow2.f32 %v2504_v14 }
 0x3e3   : > { %3499 = vpow2.f32 %v2500_v21 }
 0x3e6   : > { %v3486_v51 = vpop.eup %3485 }
 0x3e7   : > { %v3488_v0 = vpop.eup %3487  ;;  %v2548_v59 = vmul.f32 %v3486_v51, %v4770_v48 }
 0x3e8   : > { %v3490_v56 = vpop.eup %3489  ;;  %v2546_v33 = vmul.f32 %v3488_v0, %v4772_v28 }
 0x3e9   : > { %v3492_v23 = vpop.eup %3491  ;;  %v2549_v12 = vmul.f32 %v3490_v56, %v4775_v31 }
 0x3ea   : > { %v3494_v9 = vpop.eup %3493  ;;  %v2547_v30 = vmul.f32 %v3492_v23, %v4778_v37 }
 0x3eb   : > { %v3496_v43 = vpop.eup %3495  ;;  %v2559_v50 = vpack.c.bf16 %v2549_v12, %v2548_v59  ;;  %v2520_v16 = vadd.f32 1.0, %v3494_v9 }
 0x3ec   : > { %v3498_v58 = vpop.eup %3497  ;;  %v2518_v4 = vadd.f32 1.0, %v3496_v43  ;;  %v2558_v11 = vpack.c.bf16 %v2547_v30, %v2546_v33 }
 0x3ed   : > { %v3500_v32 = vpop.eup %3499  ;;  %3501 = vrcp.f32 %v2520_v16  ;;  %v2521_v42 = vadd.f32 1.0, %v3498_v58 }
 0x3ee   : > { %3503 = vrcp.f32 %v2518_v4  ;;  %v2519_v35 = vadd.f32 1.0, %v3500_v32  ;;  %3080 = vmatprep.mubr.bf16.mxu1 %v2558_v11 }
 0x3ef   : > { %3505 = vrcp.f32 %v2521_v42  ;;  %3081 = vmatmul.mubr.bf16.vlgmr.msra.gmra.mrb[64].mxu1 %v2559_v50 }
 0x3f0   : > { %3507 = vrcp.f32 %v2519_v35 }
 0x3f7   : > { %v3502_v48 = vpop.eup %3501 }
 0x3f8   : > { %v3504_v28 = vpop.eup %3503  ;;  %v2552_v8 = vmul.f32 %v3502_v48, %v2456_v19 }
 0x3f9   : > { %v3506_v31 = vpop.eup %3505  ;;  %v2550_v13 = vmul.f32 %v3504_v28, %v2454_v39 }
 0x3fa   : > { %v3508_v37 = vpop.eup %3507  ;;  %v2553_v26 = vmul.f32 %v3506_v31, %v2457_v2 }
 0x3fb   : > { %v2551_v5 = vmul.f32 %v3508_v37, %v2455_v22 }
 0x3fc   : > { %v2561_v34 = vpack.c.bf16 %v2553_v26, %v2552_v8 }
 0x3fd   : > { %v2560_v40 = vpack.c.bf16 %v2551_v5, %v2550_v13 }
 0x3ff   : > { %3084 = vmatprep.mubr.bf16.mxu1 %v2560_v40 }
 0x400   : > { %3085 = vmatmul.mubr.bf16.gmra.mrb[68].mxu1 %v2561_v34 }
 0x4a0   : > { %v3074_v18 = vpop.f32.mrb[64].mxu0 }
 0x4a1   : > { %v2676_v55 = vadd.f32 %v3074_v18, %v2929_v6  ;;  %v2667_v24 = vpop.f32.mrb[65].mxu0 }
 0x4a2   : > { %v2668_v57 = vadd.f32 %v2929_v6, %v2667_v24  ;;  %v3075_v27 = vpop.f32.mrb[66].mxu0 }
 0x4a3   : > { %2732 = vst [vmem:[%s4816_s20 + $0x10] sm:$0xff] %v2676_v55  ;;  %v2679_v38 = vadd.f32 %v3075_v27, %v2929_v6  ;;  %v2670_v44 = vpop.f32.mrb[67].mxu0 }
 0x4a4   : > { %2730 = vst [vmem:[%s4816_s20] sm:$0xff] %v2668_v57  ;;  %v2671_v41 = vadd.f32 %v2929_v6, %v2670_v44 }
 0x4a5   : > { %2733 = vst [vmem:[%s4816_s20 + $0x18] sm:$0xff] %v2679_v38 }
 0x4a6   : > { %2731 = vst [vmem:[%s4816_s20 + $0x8] sm:$0xff] %v2671_v41 }
 0x4b1   : > { %v3078_v7 = vpop.f32.mrb[68].mxu0 }
 0x4b2   : > { %v2692_v36 = vadd.f32 %v3078_v7, %v2929_v6  ;;  %v2683_v15 = vpop.f32.mrb[69].mxu0 }
 0x4b3   : > { %v2684_v47 = vadd.f32 %v2929_v6, %v2683_v15  ;;  %v3079_v45 = vpop.f32.mrb[70].mxu0 }
 0x4b4   : > { %2736 = vst [vmem:[%s4816_s20 + $0x30] sm:$0xff] %v2692_v36  ;;  %v2695_v1 = vadd.f32 %v3079_v45, %v2929_v6  ;;  %v2686_v19 = vpop.f32.mrb[71].mxu0 }
 0x4b5   : > { %2734 = vst [vmem:[%s4816_s20 + $0x20] sm:$0xff] %v2684_v47  ;;  %v2687_v17 = vadd.f32 %v2929_v6, %v2686_v19 }
 0x4b6   : > { %2737 = vst [vmem:[%s4816_s20 + $0x38] sm:$0xff] %v2695_v1 }
 0x4b7   : > { %2735 = vst [vmem:[%s4816_s20 + $0x28] sm:$0xff] %v2687_v17 }
 0x4c2   : > { %v3082_v3 = vpop.f32.mrb[64].mxu1 }
 0x4c3   : > { %v2708_v10 = vadd.f32 %v3082_v3, %v2929_v6  ;;  %v2699_v46 = vpop.f32.mrb[65].mxu1 }
 0x4c4   : > { %v2700_v39 = vadd.f32 %v2929_v6, %v2699_v46  ;;  %v3083_v60 = vpop.f32.mrb[66].mxu1 }
 0x4c5   : > { %2740 = vst [vmem:[%s4816_s20 + $0x50] sm:$0xff] %v2708_v10  ;;  %v2711_v54 = vadd.f32 %v3083_v60, %v2929_v6  ;;  %v2702_v20 = vpop.f32.mrb[67].mxu1 }
 0x4c6   : > { %2738 = vst [vmem:[%s4816_s20 + $0x40] sm:$0xff] %v2700_v39  ;;  %v2703_v25 = vadd.f32 %v2929_v6, %v2702_v20 }
 0x4c7   : > { %2741 = vst [vmem:[%s4816_s20 + $0x58] sm:$0xff] %v2711_v54 }
 0x4c8   : > { %2739 = vst [vmem:[%s4816_s20 + $0x48] sm:$0xff] %v2703_v25 }
 0x4d3   : > { %v3086_v49 = vpop.f32.mrb[68].mxu1 }
 0x4d4   : > { %v2724_v2 = vadd.f32 %v3086_v49, %v2929_v6  ;;  %v2715_v29 = vpop.f32.mrb[69].mxu1 }
 0x4d5   : > { %v2716_v52 = vadd.f32 %v2929_v6, %v2715_v29  ;;  %v3087_v22 = vpop.f32.mrb[70].mxu1 }
 0x4d6   : > { %2744 = vst [vmem:[%s4816_s20 + $0x70] sm:$0xff] %v2724_v2  ;;  %v2727_v63 = vadd.f32 %v3087_v22, %v2929_v6  ;;  %v2718_v53 = vpop.f32.mrb[71].mxu1 }
 0x4d7   : > { %2742 = vst [vmem:[%s4816_s20 + $0x60] sm:$0xff] %v2716_v52  ;;  %v2719_v62 = vadd.f32 %v2929_v6, %v2718_v53 }
 0x4d8   : > { %2745 = vst [vmem:[%s4816_s20 + $0x78] sm:$0xff] %v2727_v63 }
 0x4d9   : > { %2743 = vst [vmem:[%s4816_s20 + $0x68] sm:$0xff] %v2719_v62 }
 0x4da   : > { %3523 = shalt.err (!%p3520_p3)
}
 0x4db   : > { %s3524_s1 = scalar_lea.hbm %s4836_s26, 2048  ;;  %s3528_s20 = scalar_lea.hbm %s4901_s15, 4096 }
 0x4dc   : > { %p3525_p4 = scmp.ne.s32.totalorder %s4836_s26, %s3524_s1  ;;  %p3529_p9 = scmp.lt.u32.totalorder %s4836_s26, %s4901_s15 }
 0x4dd   : > { %p3530_p10 = scmp.lt.u32.totalorder %s3528_s20, %s3524_s1  ;;  %p3532_p12 = scmp.lt.u32.totalorder %s3524_s1, %s4836_s26 }
 0x4de   : > { %p3526_p7 = pnand %p3525_p4, %p3697_p5 }
 0x4df   : > { %p3531_p11 = por %p3530_p10, %p3529_p9 }
 0x4e0   : > { %p3527_p8 = pneg %p3526_p7 }
 0x4e1   : > { %p3533_p13 = por %p3532_p12, %p3531_p11 }
 0x4e3   : > { %p3534_p0 = pnand %p3533_p13, %p3527_p8 }
 0x4e5   : > { %3537 = shalt.err (!%p3534_p0)
}
 0x4e6   : > { %s3577_s18 = smov 128   ;;  %s3578_s27 = smov 8  }
 0x4e7   : > { %3104 = dma.vmem_to_hbm [thread:$0]  (%p3697_p5), %s4838_s25, 2048, %s4836_s26, %s4845_s22, %s3577_s18, %s3577_s18, %s3578_s27  }
 0x4e8 PF: > { %s4956_s30 = sld [smem:[#allocation5_spill]]  ;;  %p3110_p1 = scmp.ge.s32.totalorder %s3572_s21, 2 }
 0x4ea   : > { %p3107_p2 = pnand %p3110_p1, %p3701_p6 }
 0x4ee   : > { %s2775_s2 = sand.u32 1, %s4956_s30  }
 0x4ef   : > { %s2776_s1 = scalar_lea.sflag [#allocation3], %s2775_s2 }
 0x4f0   : > { %3555 = dma.done.wait (!%p3107_p2), %s2776_s1, 2048  }
 0x4f1   : > { %3557 = vsyncadd (!%p3107_p2), %s2776_s1, 4294965248  ;;  %s4958_s21 = sld [smem:[#allocation7_spill]]  ;;  %s4959_s24 = sld [smem:[#allocation6_spill]] }
 0x4f2   : > { %s4960_s20 = sld [smem:[#allocation8_spill]]  ;;  %s4961_s18 = smov %s3564_s19 }
 0x4f7   : > { %p25_p3 = scmp.ge.s32.totalorder %s4958_s21, 4   ;;  %s4962_s19 = smov %s4959_s24 }
 0x4f9   :  { %27 = sbr.rel (!%p25_p3) target bundleno = 6 (0x6), region = 121 }
 0x500   :  { %2781 = vsyncpa [#allocation3], 1 }
 0x501   :  { %2783 = vsyncpa [#allocation3 + $0x1], 1 }

</bundles_post_ra>
